<compile_context>
chip_gen: v7x
topology: tpu7x:2x2x1
jax: 0.10.0
libtpu: 0.0.40
codegen_flags: <defaults>
</compile_context>

<pallas_src>
import functools

import jax
import jax.numpy as jnp
from jax.experimental import pallas as pl


# ---- packed-slab row layout (all offsets are multiples of 8 sublanes) -------------
# rows [0, VPAD)            : fused table  fused[v] = emb[v] @ W_ih + b   (VPAD, H)
# rows [VPAD, VPAD+H)       : W_hh                                        (H, H)
# rows [VPAD+H, VPAD+2H)    : fc.weight (pre-transposed, cols padded O->H)(H, H)
# rows [VPAD+2H, VPAD+2H+8) : fc.bias   (padded to 8 rows x H cols)       (8, H)


def _imdb_rnn_kernel(text_ref, slab_ref, out_ref, *, T, B, H, O, VPAD):
    TB = T * B
    HI = jax.lax.Precision.HIGHEST

    fused = slab_ref[0:VPAD, :]                           # (VPAD, H)
    whh = slab_ref[VPAD:VPAD + H, :]                      # (H, H)
    fcw = slab_ref[VPAD + H:VPAD + 2 * H, :]              # (H, H), cols >= O are zero
    fcb = slab_ref[VPAD + 2 * H:VPAD + 2 * H + 8, :][0:1, :]   # (1, H), cols >= O zero

    # --- fused embedding gather + input projection + bias: ONE MXU matmul ---------
    # onehot rows are exact {0,1} and sum to 1, so onehot @ fused reproduces
    # emb[text] @ W_ih + b bit-exactly.
    idx = text_ref[...]                                            # (TB, 1) int32
    iota = jax.lax.broadcasted_iota(jnp.int32, (TB, VPAD), 1)      # lane-aligned K=128
    onehot = (iota == idx).astype(jnp.float32)
    xh = jnp.dot(onehot, fused, preferred_element_type=jnp.float32, precision=HI)

    # --- serial recurrence: only h @ W_hh + tanh per step (static unroll, T=8) ----
    # TODO(synk): for large T, hold W_hh in MXU weight regs (matmul_push_rhs/
    # acc_lhs/pop) and use lax.fori_loop(unroll=...) instead of a Python unroll.
    h = jnp.zeros((B, H), jnp.float32)                             # h0 = 0
    for t in range(T):                                             # T is static
        h = jnp.tanh(xh[t * B:(t + 1) * B, :]
                     + jnp.dot(h, whh, preferred_element_type=jnp.float32,
                               precision=HI))

    # --- final FC on the last hidden state (padded cols are zero, sliced off) -----
    logits = jnp.dot(h, fcw, preferred_element_type=jnp.float32, precision=HI) + fcb
    out_ref[...] = logits[:, :O].astype(out_ref.dtype)


def imdb_rnn_forward(text, emb_table, w_ih, w_hh, b, fc_w, fc_b, *, vpad=128):
    """text: [T, B] int32; returns logits [B, O]."""
    T, B = text.shape
    vocab, _E = emb_table.shape
    H = w_hh.shape[0]
    O = fc_w.shape[1]
    HI = jax.lax.Precision.HIGHEST

    # Fold embedding @ W_ih + bias into one lane-padded lookup table (exact: one-hot
    # rows sum to 1). This is a one-time weight transform outside the kernel.
    fused = jnp.dot(emb_table, w_ih, preferred_element_type=jnp.float32,
                    precision=HI) + b                              # (vocab, H)
    fused = jnp.pad(fused, ((0, vpad - vocab), (0, 0)))            # (VPAD, H)

    fcw_pad = jnp.pad(fc_w, ((0, 0), (0, H - O)))                  # (H, H)
    fcb_pad = jnp.pad(fc_b, ((0, 7), (0, H - O)))                  # (8, H)

    # One packed f32 weight slab -> kernel sees just 2 operands (text, slab).
    slab = jnp.concatenate([fused, w_hh, fcw_pad, fcb_pad], axis=0)  # (VPAD+2H+8, H)

    text2d = text.reshape(T * B, 1).astype(jnp.int32)

    kernel = functools.partial(_imdb_rnn_kernel, T=T, B=B, H=H, O=O, VPAD=vpad)
    # Single invocation, no grid: every operand is a full-array VMEM block
    # (total footprint < 30 KiB), so default (full-block) specs are used.
    # TODO(synk): at large B, add grid=(2,) over batch halves with
    # dimension_semantics=("parallel",) to engage v7x's second TensorCore.
    return pl.pallas_call(
        kernel,
        out_shape=jax.ShapeDtypeStruct((B, O), jnp.float32),
    )(text2d, slab)


def ref_forward(text, emb_table, w_ih, w_hh, b, fc_w, fc_b):
    """Pure-JAX reference (matches PyTorch nn.RNN + Linear semantics)."""
    HI = jax.lax.Precision.HIGHEST
    x = emb_table[text]                                            # [T, B, E]
    h0 = jnp.zeros((x.shape[1], w_hh.shape[0]), jnp.float32)

    def step(h, xt):
        h = jnp.tanh(jnp.dot(xt, w_ih, precision=HI)
                     + jnp.dot(h, w_hh, precision=HI) + b)
        return h, None

    hT, _ = jax.lax.scan(step, h0, x)
    return jnp.dot(hT, fc_w, precision=HI) + fc_b


if __name__ == "__main__":
    # Small shapes consistent with the module: vocab=100, E=16, H=32, O=2,
    # seq_len T=8, batch B=8.
    VOCAB, E, H, O = 100, 16, 32, 2
    T, B = 8, 8

    key = jax.random.PRNGKey(0)
    k_txt, k_emb, k_wih, k_whh, k_bih, k_bhh, k_fw, k_fb = jax.random.split(key, 8)

    text = jax.random.randint(k_txt, (T, B), 0, VOCAB, dtype=jnp.int32)

    # Deterministic parameter init (PyTorch-style uniform ranges).
    emb_table = jax.random.normal(k_emb, (VOCAB, E), jnp.float32)
    bound = 1.0 / jnp.sqrt(H)
    # PyTorch stores weight_ih_l0 as (H, E), weight_hh_l0 as (H, H),
    # fc.weight as (O, H); we keep them pre-transposed for x @ W form.
    w_ih = jax.random.uniform(k_wih, (E, H), jnp.float32, -bound, bound)
    w_hh = jax.random.uniform(k_whh, (H, H), jnp.float32, -bound, bound)
    b_ih = jax.random.uniform(k_bih, (1, H), jnp.float32, -bound, bound)
    b_hh = jax.random.uniform(k_bhh, (1, H), jnp.float32, -bound, bound)
    b = b_ih + b_hh
    fbound = 1.0 / jnp.sqrt(H)
    fc_w = jax.random.uniform(k_fw, (H, O), jnp.float32, -fbound, fbound)
    fc_b = jax.random.uniform(k_fb, (1, O), jnp.float32, -fbound, fbound)

    out = imdb_rnn_forward(text, emb_table, w_ih, w_hh, b, fc_w, fc_b)
    out = jax.block_until_ready(out)

    ref = ref_forward(text, emb_table, w_ih, w_hh, b, fc_w, fc_b)
    assert out.shape == (B, O)
    assert jnp.allclose(out, ref, atol=1e-5, rtol=1e-5), "mismatch vs reference"

    print("KERNEL_OK")
</pallas_src>

<mosaic_0001>
module attributes {stable_mosaic.version = 11 : i64} {
  func.func @_imdb_rnn_kernel(%arg0: memref<64x1xi32, #tpu.memory_space<vmem>>, %arg1: memref<200x32xf32, #tpu.memory_space<vmem>>, %arg2: memref<8x2xf32, #tpu.memory_space<vmem>>) attributes {dimension_semantics = [], scalar_prefetch = 0 : i64, scratch_operands = 0 : i64, tpu.core_type = #tpu.core_type<tc>} {
    %c0 = arith.constant 0 : index
    %c0_0 = arith.constant 0 : index
    %0 = vector.load %arg1[%c0, %c0_0] : memref<200x32xf32, #tpu.memory_space<vmem>>, vector<128x32xf32>
    %c128 = arith.constant 128 : index
    %c0_1 = arith.constant 0 : index
    %1 = vector.load %arg1[%c128, %c0_1] : memref<200x32xf32, #tpu.memory_space<vmem>>, vector<32x32xf32>
    %c160 = arith.constant 160 : index
    %c0_2 = arith.constant 0 : index
    %2 = vector.load %arg1[%c160, %c0_2] : memref<200x32xf32, #tpu.memory_space<vmem>>, vector<32x32xf32>
    %c192 = arith.constant 192 : index
    %c0_3 = arith.constant 0 : index
    %3 = vector.load %arg1[%c192, %c0_3] : memref<200x32xf32, #tpu.memory_space<vmem>>, vector<8x32xf32>
    %4 = vector.extract_strided_slice %3 {offsets = [0, 0], sizes = [1, 32], strides = [1, 1]} : vector<8x32xf32> to vector<1x32xf32>
    %c0_4 = arith.constant 0 : index
    %c0_5 = arith.constant 0 : index
    %5 = vector.load %arg0[%c0_4, %c0_5] : memref<64x1xi32, #tpu.memory_space<vmem>>, vector<64x1xi32>
    %6 = tpu.iota {dimensions = array<i32: 1>} : vector<64x128xi32>
    %7 = vector.broadcast %5 : vector<64x1xi32> to vector<64x128xi32>
    %8 = arith.cmpi eq, %6, %7 : vector<64x128xi32>
    %9 = arith.extui %8 : vector<64x128xi1> to vector<64x128xi32>
    %10 = arith.sitofp %9 : vector<64x128xi32> to vector<64x128xf32>
    %cst = arith.constant dense<0.000000e+00> : vector<64x32xf32>
    %11 = tpu.matmul %10, %0, %cst {dimension_numbers = #tpu.dot_dimension_numbers<[1], [0], [0], [1], [0, 0, 1, 1], [], []>, precision = #tpu.contract_precision<fp32>} : vector<64x128xf32>, vector<128x32xf32>, vector<64x32xf32> -> vector<64x32xf32>
    %cst_6 = arith.constant 0.000000e+00 : f32
    %12 = vector.broadcast %cst_6 : f32 to vector<8x32xf32>
    %13 = vector.extract_strided_slice %11 {offsets = [0, 0], sizes = [8, 32], strides = [1, 1]} : vector<64x32xf32> to vector<8x32xf32>
    %cst_7 = arith.constant dense<0.000000e+00> : vector<8x32xf32>
    %14 = tpu.matmul %12, %1, %cst_7 {dimension_numbers = #tpu.dot_dimension_numbers<[1], [0], [0], [1], [0, 0, 1, 1], [], []>, precision = #tpu.contract_precision<fp32>} : vector<8x32xf32>, vector<32x32xf32>, vector<8x32xf32> -> vector<8x32xf32>
    %15 = arith.addf %13, %14 : vector<8x32xf32>
    %16 = math.tanh %15 : vector<8x32xf32>
    %17 = vector.extract_strided_slice %11 {offsets = [8, 0], sizes = [8, 32], strides = [1, 1]} : vector<64x32xf32> to vector<8x32xf32>
    %cst_8 = arith.constant dense<0.000000e+00> : vector<8x32xf32>
    %18 = tpu.matmul %16, %1, %cst_8 {dimension_numbers = #tpu.dot_dimension_numbers<[1], [0], [0], [1], [0, 0, 1, 1], [], []>, precision = #tpu.contract_precision<fp32>} : vector<8x32xf32>, vector<32x32xf32>, vector<8x32xf32> -> vector<8x32xf32>
    %19 = arith.addf %17, %18 : vector<8x32xf32>
    %20 = math.tanh %19 : vector<8x32xf32>
    %21 = vector.extract_strided_slice %11 {offsets = [16, 0], sizes = [8, 32], strides = [1, 1]} : vector<64x32xf32> to vector<8x32xf32>
    %cst_9 = arith.constant dense<0.000000e+00> : vector<8x32xf32>
    %22 = tpu.matmul %20, %1, %cst_9 {dimension_numbers = #tpu.dot_dimension_numbers<[1], [0], [0], [1], [0, 0, 1, 1], [], []>, precision = #tpu.contract_precision<fp32>} : vector<8x32xf32>, vector<32x32xf32>, vector<8x32xf32> -> vector<8x32xf32>
    %23 = arith.addf %21, %22 : vector<8x32xf32>
    %24 = math.tanh %23 : vector<8x32xf32>
    %25 = vector.extract_strided_slice %11 {offsets = [24, 0], sizes = [8, 32], strides = [1, 1]} : vector<64x32xf32> to vector<8x32xf32>
    %cst_10 = arith.constant dense<0.000000e+00> : vector<8x32xf32>
    %26 = tpu.matmul %24, %1, %cst_10 {dimension_numbers = #tpu.dot_dimension_numbers<[1], [0], [0], [1], [0, 0, 1, 1], [], []>, precision = #tpu.contract_precision<fp32>} : vector<8x32xf32>, vector<32x32xf32>, vector<8x32xf32> -> vector<8x32xf32>
    %27 = arith.addf %25, %26 : vector<8x32xf32>
    %28 = math.tanh %27 : vector<8x32xf32>
    %29 = vector.extract_strided_slice %11 {offsets = [32, 0], sizes = [8, 32], strides = [1, 1]} : vector<64x32xf32> to vector<8x32xf32>
    %cst_11 = arith.constant dense<0.000000e+00> : vector<8x32xf32>
    %30 = tpu.matmul %28, %1, %cst_11 {dimension_numbers = #tpu.dot_dimension_numbers<[1], [0], [0], [1], [0, 0, 1, 1], [], []>, precision = #tpu.contract_precision<fp32>} : vector<8x32xf32>, vector<32x32xf32>, vector<8x32xf32> -> vector<8x32xf32>
    %31 = arith.addf %29, %30 : vector<8x32xf32>
    %32 = math.tanh %31 : vector<8x32xf32>
    %33 = vector.extract_strided_slice %11 {offsets = [40, 0], sizes = [8, 32], strides = [1, 1]} : vector<64x32xf32> to vector<8x32xf32>
    %cst_12 = arith.constant dense<0.000000e+00> : vector<8x32xf32>
    %34 = tpu.matmul %32, %1, %cst_12 {dimension_numbers = #tpu.dot_dimension_numbers<[1], [0], [0], [1], [0, 0, 1, 1], [], []>, precision = #tpu.contract_precision<fp32>} : vector<8x32xf32>, vector<32x32xf32>, vector<8x32xf32> -> vector<8x32xf32>
    %35 = arith.addf %33, %34 : vector<8x32xf32>
    %36 = math.tanh %35 : vector<8x32xf32>
    %37 = vector.extract_strided_slice %11 {offsets = [48, 0], sizes = [8, 32], strides = [1, 1]} : vector<64x32xf32> to vector<8x32xf32>
    %cst_13 = arith.constant dense<0.000000e+00> : vector<8x32xf32>
    %38 = tpu.matmul %36, %1, %cst_13 {dimension_numbers = #tpu.dot_dimension_numbers<[1], [0], [0], [1], [0, 0, 1, 1], [], []>, precision = #tpu.contract_precision<fp32>} : vector<8x32xf32>, vector<32x32xf32>, vector<8x32xf32> -> vector<8x32xf32>
    %39 = arith.addf %37, %38 : vector<8x32xf32>
    %40 = math.tanh %39 : vector<8x32xf32>
    %41 = vector.extract_strided_slice %11 {offsets = [56, 0], sizes = [8, 32], strides = [1, 1]} : vector<64x32xf32> to vector<8x32xf32>
    %cst_14 = arith.constant dense<0.000000e+00> : vector<8x32xf32>
    %42 = tpu.matmul %40, %1, %cst_14 {dimension_numbers = #tpu.dot_dimension_numbers<[1], [0], [0], [1], [0, 0, 1, 1], [], []>, precision = #tpu.contract_precision<fp32>} : vector<8x32xf32>, vector<32x32xf32>, vector<8x32xf32> -> vector<8x32xf32>
    %43 = arith.addf %41, %42 : vector<8x32xf32>
    %44 = math.tanh %43 : vector<8x32xf32>
    %cst_15 = arith.constant dense<0.000000e+00> : vector<8x32xf32>
    %45 = tpu.matmul %44, %2, %cst_15 {dimension_numbers = #tpu.dot_dimension_numbers<[1], [0], [0], [1], [0, 0, 1, 1], [], []>, precision = #tpu.contract_precision<fp32>} : vector<8x32xf32>, vector<32x32xf32>, vector<8x32xf32> -> vector<8x32xf32>
    %46 = vector.broadcast %4 : vector<1x32xf32> to vector<8x32xf32>
    %47 = arith.addf %45, %46 : vector<8x32xf32>
    %48 = vector.extract_strided_slice %47 {offsets = [0, 0], sizes = [8, 2], strides = [1, 1]} : vector<8x32xf32> to vector<8x2xf32>
    %c0_16 = arith.constant 0 : index
    %c0_17 = arith.constant 0 : index
    %49 = vector.load %arg2[%c0_16, %c0_17] : memref<8x2xf32, #tpu.memory_space<vmem>>, vector<8x2xf32>
    tpu.vector_store %arg2[%c0_16, %c0_17], %48 {strides = array<i32>} : memref<8x2xf32, #tpu.memory_space<vmem>>, vector<8x2xf32>,
    return
  }
}

</mosaic_0001>

<bundles_post_ra>
// kernel: tpu_custom_call.1
= control target key start
LH: loop header
LB: loop body
LE: loop exit
PB: predicated region body
PF: predicated region fallthrough
CT: control target
= control target key end

     0   :  { %v7428_v0 = vmov 0   ;;  %vm7431_vm8 = vmmov 0   ;;  %vm1036_vm9 = vcmask 261120   ;;  %vm5449_vm10 = vcmask 15360   ;;  %s8451_s0 = inlined_call_operand.vmem [shape: s32[64,1], index: 0, kind: input, shape index: {}]   ;;  %s8452_s1 = inlined_call_operand.vmem [shape: f32[200,32], index: 1, kind: input, shape index: {}]   ;;  %s8453_s2 = inlined_call_operand.vmem [shape: f32[8,2], index: 2, kind: output, shape index: {}]  }
   0x1   :  { %7410 = vset.pattern.permute.xlu0 %v7428_v0  ;;  %v36_v1 = vld [vmem:[%s8451_s0] sm:$0xff]  ;;  %7411 = vset.pattern.permute.xlu1 %v7428_v0  ;;  %v38_v2 = vld [vmem:[%s8451_s0 + $0x10] sm:$0xff]  ;;  %v37_v3 = vld [vmem:[%s8451_s0 + $0x8] sm:$0xff] }
   0x2   :  { %47 = vperm.xlu0 %7410, %v36_v1   ;;  %53 = vperm.xlu1 %7411, %v38_v2   ;;  %v39_v4 = vld [vmem:[%s8451_s0 + $0x18] sm:$0xff]  ;;  %v11_v5 = vld [vmem:[%s8452_s1] sm:$0xff]  ;;  %v12_v6 = vld [vmem:[%s8452_s1 + $0x8] sm:$0xff] }
   0x3   :  { %v95_v7 = vand.u32 4294901760, %v11_v5  ;;  %v13_v8 = vld [vmem:[%s8452_s1 + $0x10] sm:$0xff]  ;;  %v14_v9 = vld [vmem:[%s8452_s1 + $0x18] sm:$0xff]  ;;  %v98_v10 = vand.u32 4294901760, %v12_v6  ;;  %v15_v13 = vld [vmem:[%s8452_s1 + $0x20] sm:$0xff] }
   0x4   :  { %v101_v11 = vand.u32 4294901760, %v13_v8  ;;  %v104_v12 = vand.u32 4294901760, %v14_v9  ;;  %v16_v14 = vld [vmem:[%s8452_s1 + $0x28] sm:$0xff]  ;;  %v40_v15 = vld [vmem:[%s8451_s0 + $0x20] sm:$0xff]  ;;  %v107_v19 = vand.u32 4294901760, %v15_v13  ;;  %v17_v21 = vld [vmem:[%s8452_s1 + $0x30] sm:$0xff] }
   0x5   :  { %v41_v16 = vld [vmem:[%s8451_s0 + $0x28] sm:$0xff]  ;;  %v7484_v17 = vpack.c.bf16 %v98_v10, %v95_v7  ;;  %v110_v20 = vand.u32 4294901760, %v16_v14  ;;  %v18_v22 = vld [vmem:[%s8452_s1 + $0x38] sm:$0xff]  ;;  %v42_v23 = vld [vmem:[%s8451_s0 + $0x30] sm:$0xff]  ;;  %v113_v28 = vand.u32 4294901760, %v17_v21  ;;  %v7539_v46 = vsub.f32 %v11_v5, %v95_v7 }
   0x6   :  { %50 = vperm.xlu0 %7410, %v37_v3   ;;  %56 = vperm.xlu1 %7411, %v39_v4   ;;  %v7486_v18 = vpack.c.bf16 %v104_v12, %v101_v11  ;;  %v43_v24 = vld [vmem:[%s8451_s0 + $0x38] sm:$0xff]  ;;  %v7502_v25 = vsub.f32 %v13_v8, %v101_v11  ;;  %v7504_v26 = vsub.f32 %v14_v9, %v104_v12  ;;  %v116_v29 = vand.u32 4294901760, %v18_v22  ;;  %v19_v30 = vld [vmem:[%s8452_s1 + $0x40] sm:$0xff]  ;;  %v20_v31 = vld [vmem:[%s8452_s1 + $0x48] sm:$0xff] }
   0x7   :  { %6760 = vmatprep.subr.bf16.mxu0 %v7484_v17  ;;  %v7507_v27 = vpack.c.bf16 %v110_v20, %v107_v19  ;;  %v21_v34 = vld [vmem:[%s8452_s1 + $0x50] sm:$0xff]  ;;  %v7520_v35 = vsub.f32 %v15_v13, %v107_v19  ;;  %v7522_v36 = vsub.f32 %v16_v14, %v110_v20  ;;  %v119_v37 = vand.u32 4294901760, %v19_v30  ;;  %v22_v42 = vld [vmem:[%s8452_s1 + $0x58] sm:$0xff]  ;;  %v23_v49 = vld [vmem:[%s8452_s1 + $0x60] sm:$0xff] }
   0x8   :  { %6762 = vmatpush3.bf16.msra.mxu0 %v7484_v17  ;;  %8491 = vst [vmem:[#allocation2_spill] sm:$0xff] %v7504_v26  ;;  %v8469_v32 = vand.u32 4294901760, %v7502_v25  ;;  %v8468_v33 = vand.u32 4294901760, %v7504_v26  ;;  %v122_v38 = vand.u32 4294901760, %v20_v31  ;;  %v7532_v41 = vpack.c.bf16 %v116_v29, %v113_v28  ;;  %v24_v58 = vld [vmem:[%s8452_s1 + $0x68] sm:$0xff]  ;;  %v25_v0 = vld [vmem:[%s8452_s1 + $0x70] sm:$0xff] }
   0x9   :  { %6764 = vmatprep.subr.bf16.mxu0 %v7486_v18  ;;  %8492 = vst [vmem:[#allocation3_spill] sm:$0xff] %v7520_v35  ;;  %8493 = vst [vmem:[#allocation4_spill] sm:$0xff] %v7522_v36  ;;  %v8466_v43 = vand.u32 4294901760, %v7520_v35  ;;  %v8465_v44 = vand.u32 4294901760, %v7522_v36  ;;  %v125_v45 = vand.u32 4294901760, %v21_v34  ;;  %v7550_v52 = vsub.f32 %v17_v21, %v113_v28 }
   0xa   :  { %59 = vperm.xlu0 %7410, %v40_v15   ;;  %62 = vperm.xlu1 %7411, %v41_v16   ;;  %v273_v39 = vsub.f32 %v7502_v25, %v8469_v32  ;;  %v280_v40 = vsub.f32 %v7504_v26, %v8468_v33  ;;  %v7552_v53 = vsub.f32 %v18_v22, %v116_v29  ;;  %v128_v55 = vand.u32 4294901760, %v22_v42 }
   0xb   :  { %v287_v50 = vsub.f32 %v7520_v35, %v8466_v43  ;;  %v294_v51 = vsub.f32 %v7522_v36, %v8465_v44  ;;  %8494 = vst [vmem:[#allocation5_spill] sm:$0xff] %v7550_v52  ;;  %v7555_v54 = vpack.c.bf16 %v122_v38, %v119_v37  ;;  %v7557_v56 = vsub.f32 %v12_v6, %v98_v10  ;;  %v26_v10 = vld [vmem:[%s8452_s1 + $0x78] sm:$0xff]  ;;  %v7765_v43 = vld [vmem:[%s8452_s1 + $0x88] sm:$0xff] }
   0xc   :  { %6766 = vmatpush3.bf16.msra.mxu0 %v7486_v18  ;;  %v274_v47 = vand.u32 4294901760, %v273_v39  ;;  %v281_v48 = vand.u32 4294901760, %v280_v40  ;;  %8495 = vst [vmem:[#allocation6_spill] sm:$0xff] %v7552_v53  ;;  %v8464_v61 = vand.u32 4294901760, %v7550_v52  ;;  %v8463_v62 = vand.u32 4294901760, %v7552_v53 }
   0xd   :  { %6768 = vmatprep.subr.bf16.mxu0 %v7507_v27  ;;  %v288_v59 = vand.u32 4294901760, %v287_v50  ;;  %v295_v60 = vand.u32 4294901760, %v294_v51  ;;  %v131_v63 = vand.u32 4294901760, %v23_v49  ;;  %v7578_v4 = vsub.f32 %v19_v30, %v119_v37 }
   0xe   :  { %65 = vperm.xlu0 %7410, %v42_v23   ;;  %68 = vperm.xlu1 %7411, %v43_v24   ;;  %v7559_v57 = vpack.c.bf16 %v281_v48, %v274_v47  ;;  %v301_v2 = vsub.f32 %v7550_v52, %v8464_v61  ;;  %v308_v3 = vsub.f32 %v7552_v53, %v8463_v62  ;;  %v134_v5 = vand.u32 4294901760, %v24_v58 }
   0xf   :  { %v7570_v1 = vpack.c.bf16 %v295_v60, %v288_v59  ;;  %8496 = vst [vmem:[#allocation7_spill] sm:$0xff] %v7578_v4  ;;  %v8471_v6 = vand.u32 4294901760, %v7539_v46  ;;  %v8470_v7 = vand.u32 4294901760, %v7557_v56  ;;  %v7583_v8 = vsub.f32 %v20_v31, %v122_v38 }
  0x10   :  { %6770 = vmatpush3.bf16.msra.mxu0 %v7507_v27  ;;  %v7586_v9 = vpack.c.bf16 %v128_v55, %v125_v45  ;;  %v302_v11 = vand.u32 4294901760, %v301_v2  ;;  %v309_v12 = vand.u32 4294901760, %v308_v3  ;;  %v8462_v13 = vand.u32 4294901760, %v7578_v4 }
  0x11   :  { %6772 = vmatprep.subr.bf16.mxu0 %v7532_v41  ;;  %8497 = vst [vmem:[#allocation8_spill] sm:$0xff] %v7583_v8  ;;  %v137_v14 = vand.u32 4294901760, %v25_v0  ;;  %v8461_v15 = vand.u32 4294901760, %v7583_v8  ;;  %v7598_v20 = vsub.f32 %v21_v34, %v125_v45  ;;  %v7600_v21 = vsub.f32 %v22_v42, %v128_v55 }
  0x12   :  { %v7593_v16 = vpack.c.bf16 %v309_v12, %v302_v11  ;;  %v315_v19 = vsub.f32 %v7578_v4, %v8462_v13  ;;  %v140_v22 = vand.u32 4294901760, %v26_v10  ;;  %v259_v23 = vsub.f32 %v7539_v46, %v8471_v6 }
  0x13   :  { %8498 = vst [vmem:[#allocation9_spill] sm:$0xff] %v7598_v20  ;;  %8499 = vst [vmem:[#allocation10_spill] sm:$0xff] %v7600_v21  ;;  %v266_v24 = vsub.f32 %v7557_v56, %v8470_v7  ;;  %v322_v28 = vsub.f32 %v7583_v8, %v8461_v15  ;;  %v7613_v29 = vpack.c.bf16 %v134_v5, %v131_v63  ;;  %v8460_v31 = vand.u32 4294901760, %v7598_v20 }
  0x14   :  { %6774 = vmatpush3.bf16.msra.mxu0 %v7532_v41  ;;  %v316_v30 = vand.u32 4294901760, %v315_v19  ;;  %v8459_v34 = vand.u32 4294901760, %v7600_v21  ;;  %v7623_v40 = vsub.f32 %v23_v49, %v131_v63  ;;  %v7625_v42 = vsub.f32 %v24_v58, %v134_v5 }
  0x15   :  { %6776 = vmatprep.subr.bf16.mxu0 %v7555_v54  ;;  %v323_v37 = vand.u32 4294901760, %v322_v28  ;;  %v329_v38 = vsub.f32 %v7598_v20, %v8460_v31  ;;  %v7628_v45 = vpack.c.bf16 %v140_v22, %v137_v14  ;;  %v260_v47 = vand.u32 4294901760, %v259_v23 }
  0x16   :  { %v336_v39 = vsub.f32 %v7600_v21, %v8459_v34  ;;  %8500 = vst [vmem:[#allocation11_spill] sm:$0xff] %v7623_v40  ;;  %8501 = vst [vmem:[#allocation12_spill] sm:$0xff] %v7625_v42  ;;  %v267_v48 = vand.u32 4294901760, %v266_v24  ;;  %v8458_v59 = vand.u32 4294901760, %v7623_v40  ;;  %v8457_v60 = vand.u32 4294901760, %v7625_v42 }
  0x17   :  { %v7630_v50 = vpack.c.bf16 %v323_v37, %v316_v30  ;;  %v330_v51 = vand.u32 4294901760, %v329_v38  ;;  %v7643_v2 = vsub.f32 %v25_v0, %v137_v14  ;;  %v7646_v3 = vsub.f32 %v26_v10, %v140_v22 }
  0x18   :  { %6778 = vmatpush3.bf16.msra.mxu0 %v7555_v54  ;;  %v337_v55 = vand.u32 4294901760, %v336_v39  ;;  %v343_v58 = vsub.f32 %v7623_v40, %v8458_v59  ;;  %v350_v63 = vsub.f32 %v7625_v42, %v8457_v60  ;;  %v7649_v5 = vpack.c.bf16 %v267_v48, %v260_v47 }
  0x19   :  { %6780 = vmatprep.subr.bf16.mxu0 %v7586_v9  ;;  %8502 = vst [vmem:[#allocation13_spill] sm:$0xff] %v7643_v2  ;;  %8503 = vst [vmem:[#allocation14_spill] sm:$0xff] %v7646_v3  ;;  %v8456_v19 = vand.u32 4294901760, %v7643_v2  ;;  %v8455_v23 = vand.u32 4294901760, %v7646_v3  ;;  %v7667_v30 = vpack.c.bf16 %v7557_v56, %v7539_v46  ;;  %v7671_v37 = vpack.c.bf16 %v7504_v26, %v7502_v25 }
  0x1a   :  { %v7635_v49 = vpack.c.bf16 %v337_v55, %v330_v51  ;;  %v344_v11 = vand.u32 4294901760, %v343_v58  ;;  %v351_v12 = vand.u32 4294901760, %v350_v63  ;;  %v7675_v38 = vpack.c.bf16 %v7522_v36, %v7520_v35 }
  0x1b   :  { %v357_v0 = vsub.f32 %v7643_v2, %v8456_v19  ;;  %v364_v10 = vsub.f32 %v7646_v3, %v8455_v23  ;;  %v7679_v39 = vpack.c.bf16 %v7552_v53, %v7550_v52  ;;  %v7683_v47 = vpack.c.bf16 %v7583_v8, %v7578_v4  ;;  %v30_v53 = vld [vmem:[%s8452_s1 + $0x98] sm:$0xff] }
  0x1c   :  { %6782 = vmatpush3.bf16.msra.mxu0 %v7586_v9  ;;  %v7653_v24 = vpack.c.bf16 %v351_v12, %v344_v11  ;;  %v7687_v48 = vpack.c.bf16 %v7600_v21, %v7598_v20  ;;  %v7691_v51 = vpack.c.bf16 %v7625_v42, %v7623_v40  ;;  %v7695_v55 = vpack.c.bf16 %v7646_v3, %v7643_v2 }
  0x1d   :  { %6784 = vmatprep.subr.bf16.mxu0 %v7613_v29  ;;  %v358_v14 = vand.u32 4294901760, %v357_v0  ;;  %v365_v22 = vand.u32 4294901760, %v364_v10  ;;  %v8454_v58 = vlaneseq  ;;  %v8475_v0 = vmov 0.0  }
  0x1e   :  { %v7430_v36 = vmov 0.0|0.0  }
  0x1f   :  { %v7663_v28 = vpack.c.bf16 %v365_v22, %v358_v14  ;;  %v7698_v63 = vand.u32 127, %v8454_v58  ;;  %6963 = vmatprep.subr.bf16.mxu1 %v7430_v36 }
  0x20   :  { %6786 = vmatpush3.bf16.msra.mxu0 %v7613_v29 }
  0x21   :  { %6788 = vmatprep.subr.bf16.mxu0 %v7628_v45 }
  0x24   :  { %6790 = vmatpush3.bf16.msra.mxu0 %v7628_v45 }
  0x25   :  { %6792 = vmatprep.subr.bf16.mxu0 %v7649_v5 }
  0x81   :  { %v7700_v11 = vpop.permute.xlu0 %47  ;;  %v7702_v12 = vpop.permute.xlu1 %53 }
  0x82   :  { %vm70_vm0 = vcmp.eq.s32.totalorder %v7698_v63, %v7700_v11  ;;  %vm72_vm1 = vcmp.eq.s32.totalorder %v7698_v63, %v7702_v12 }
  0x83   :  { %v5455_v10 = vsel %vm70_vm0, 1.0, %v8475_v0  ;;  %v5457_v14 = vsel %vm72_vm1, 1.0, %v8475_v0 }
  0x84   :  { %v7716_v22 = vsub.f32 %v5455_v10, %v5455_v10  ;;  %v7718_v58 = vsub.f32 %v5457_v14, %v5457_v14 }
  0x85   :  { %v7720_v23 = vpop.permute.xlu0 %50  ;;  %v7722_v19 = vpop.permute.xlu1 %56 }
  0x86   :  { %vm71_vm2 = vcmp.eq.s32.totalorder %v7698_v63, %v7720_v23  ;;  %vm73_vm3 = vcmp.eq.s32.totalorder %v7698_v63, %v7722_v19  ;;  %v8472_v60 = vand.u32 4294901760, %v7716_v22  ;;  %v8467_v59 = vand.u32 4294901760, %v7718_v58 }
  0x87   :  { %v5456_v10 = vsel %vm71_vm2, 1.0, %v8475_v0  ;;  %v5458_v14 = vsel %vm73_vm3, 1.0, %v8475_v0 }
  0x88   :  { %v7738_v34 = vsub.f32 %v5456_v10, %v5456_v10  ;;  %v7740_v31 = vsub.f32 %v5458_v14, %v5458_v14  ;;  %v178_v15 = vsub.f32 %v7716_v22, %v8472_v60  ;;  %v198_v61 = vsub.f32 %v7718_v58, %v8467_v59  ;;  %v7760_v14 = vld [vmem:[%s8452_s1 + $0x80] sm:$0xff] }
  0x89   :  { %v7745_v13 = vpop.permute.xlu0 %59  ;;  %v7747_v62 = vpop.permute.xlu1 %62  ;;  %v1041_v42 = vand.u32 4294901760, %v7760_v14 }
  0x8a   :  { %vm74_vm4 = vcmp.eq.s32.totalorder %v7698_v63, %v7745_v13  ;;  %v179_v44 = vand.u32 4294901760, %v178_v15  ;;  %vm75_vm5 = vcmp.eq.s32.totalorder %v7698_v63, %v7747_v62  ;;  %v8478_v10 = vand.u32 4294901760, %v7738_v34 }
  0x8b   :  { %v5459_v15 = vsel %vm74_vm4, 1.0, %v8475_v0  ;;  %v5460_v59 = vsel %vm75_vm5, 1.0, %v8475_v0  ;;  %v8479_v33 = vand.u32 4294901760, %v7740_v31  ;;  %v199_v2 = vand.u32 4294901760, %v198_v61  ;;  %v29_v61 = vld [vmem:[%s8452_s1 + $0x90] sm:$0xff] }
  0x8c   :  { %v7776_v32 = vsub.f32 %v5459_v15, %v5459_v15  ;;  %5933 = vmatprep.mubr.f32.mxu0 %v179_v44  ;;  %v7778_v7 = vsub.f32 %v5460_v59, %v5460_v59  ;;  %v188_v6 = vsub.f32 %v7738_v34, %v8478_v10  ;;  %v1044_v15 = vand.u32 4294901760, %v7765_v43 }
  0x8d   :  { %v7783_v60 = vpop.permute.xlu0 %65  ;;  %v7785_v3 = vpop.permute.xlu1 %68  ;;  %v208_v0 = vsub.f32 %v7740_v31, %v8479_v33  ;;  %v8504_v10 = vmov 0.0  }
  0x8e   :  { %vm76_vm6 = vcmp.eq.s32.totalorder %v7698_v63, %v7783_v60  ;;  %v189_v44 = vand.u32 4294901760, %v188_v6  ;;  %vm77_vm7 = vcmp.eq.s32.totalorder %v7698_v63, %v7785_v3  ;;  %v8489_v21 = vand.u32 4294901760, %v7778_v7  ;;  %6195 = vmatprep.mubr.msk.f32.mxu1 %vm7431_vm8, %v8504_v10 }
  0x8f   :  { %v5461_v33 = vsel %vm76_vm6, 1.0, %v8504_v10  ;;  %v5462_v40 = vsel %vm77_vm7, 1.0, %v8504_v10  ;;  %v209_v6 = vand.u32 4294901760, %v208_v0  ;;  %v8505_v8 = vand.u32 4294901760, %v7776_v32 }
  0x90   :  { %v7809_v20 = vsub.f32 %v5461_v33, %v5461_v33  ;;  %5934 = vmatmul.mubr.f32.vlgmr.msra.gmra.mrb[0].mxu0 %v189_v44  ;;  %v7811_v59 = vsub.f32 %v5462_v40, %v5462_v40  ;;  %v228_v0 = vsub.f32 %v7778_v7, %v8489_v21  ;;  %v7824_v33 = vsub.f32 %v7760_v14, %v1041_v42 }
  0x91   :  { %v218_v4 = vsub.f32 %v7776_v32, %v8505_v8  ;;  %6794 = vmatpush3.bf16.msra.mxu0 %v7649_v5  ;;  %5936 = vmatprep.mubr.f32.mxu0 %v199_v2  ;;  %v1047_v40 = vand.u32 4294901760, %v29_v61  ;;  %v7831_v2 = vsub.f32 %v7765_v43, %v1044_v15  ;;  %v1050_v5 = vand.u32 4294901760, %v30_v53 }
  0x92   :  { %6796 = vmatprep.subr.bf16.mxu0 %v7559_v57  ;;  %v237_v8 = vand.u32 4294901760, %v7809_v20  ;;  %v247_v52 = vand.u32 4294901760, %v7811_v59  ;;  %v229_v14 = vand.u32 4294901760, %v228_v0 }
  0x93   :  { %v219_v44 = vand.u32 4294901760, %v218_v4  ;;  %v7833_v35 = vsub.f32 %v29_v61, %v1047_v40  ;;  %v7843_v26 = vpack.c.bf16 %v7831_v2, %v7824_v33  ;;  %v7846_v43 = vsub.f32 %v30_v53, %v1050_v5 }
  0x94   :  { %5937 = vmatmul.mubr.f32.gmra.mrb[2].mxu0 %v209_v6  ;;  %v238_v21 = vsub.f32 %v7809_v20, %v237_v8  ;;  %v248_v4 = vsub.f32 %v7811_v59, %v247_v52  ;;  %v7860_v53 = vpack.c.bf16 %v1044_v15, %v1041_v42  ;;  %v1122_v42 = vand.u32 4294901760, %v7824_v33 }
  0x95   :  { %6798 = vmatpush3.bf16.msra.mxu0 %v7559_v57  ;;  %5939 = vmatprep.mubr.f32.mxu0 %v219_v44  ;;  %v7853_v6 = vpack.c.bf16 %v7846_v43, %v7833_v35  ;;  %v1136_v0 = vand.u32 4294901760, %v7833_v35 }
  0x96   :  { %6800 = vmatprep.subr.bf16.mxu0 %v7570_v1  ;;  %v239_v61 = vand.u32 4294901760, %v238_v21  ;;  %6965 = vmatpush3.bf16.msra.mxu1 %v7843_v26  ;;  %v249_v57 = vand.u32 4294901760, %v248_v4  ;;  %v7432_v21 = vmov 1.0   ;;  %v8512_v4 = vand.u32 4294901760, %v7738_v34 }
  0x97   :  { %6966 = vmatprep.subr.bf16.mxu1 %v7430_v36 }
  0x98   :  { %5940 = vmatmul.mubr.f32.gmra.mrb[4].mxu0 %v229_v14 }
  0x99   :  { %6802 = vmatpush3.bf16.msra.mxu0 %v7570_v1  ;;  %5942 = vmatprep.mubr.f32.mxu0 %v239_v61  ;;  %v7870_v1 = vpack.c.bf16 %v1050_v5, %v1047_v40  ;;  %v1143_v40 = vand.u32 4294901760, %v7846_v43 }
  0x9a   :  { %6804 = vmatprep.subr.bf16.mxu0 %v7593_v16  ;;  %6968 = vmatpush3.bf16.msra.mxu1 %v7853_v6 }
  0x9b   :  { %6969 = vmatprep.subr.bf16.mxu1 %v7430_v36 }
  0x9c   :  { %5943 = vmatmul.mubr.f32.gmra.mrb[6].mxu0 %v249_v57 }
  0x9d   :  { %6806 = vmatpush3.bf16.msra.mxu0 %v7593_v16  ;;  %5977 = vmatprep.mubr.msk.f32.mxu0 %vm70_vm0, %v7432_v21  ;;  %v1129_v16 = vand.u32 4294901760, %v7831_v2 }
  0x9e   :  { %6808 = vmatprep.subr.bf16.mxu0 %v7630_v50  ;;  %6196 = vmatmul.mubr.f32.vlgmr.msra.gmra.mrb[0].mxu1 %v8504_v10 }
  0x9f   :  { %6971 = vmatpush3.bf16.msra.mxu1 %v7860_v53  ;;  %6206 = vmatprep.mubr.msk.f32.mxu1 %vm7431_vm8, %v8504_v10  ;;  %v7881_v15 = vpack.c.bf16 %v1129_v16, %v1122_v42 }
  0xa0   :  { %6972 = vmatprep.subr.bf16.mxu1 %v7430_v36 }
  0xa1   :  { %6810 = vmatpush3.bf16.msra.mxu0 %v7630_v50  ;;  %v7890_v50 = vpack.c.bf16 %v1143_v40, %v1136_v0 }
  0xa2   :  { %6812 = vmatprep.subr.bf16.mxu0 %v7635_v49 }
  0xa3   :  { %6974 = vmatpush3.bf16.msra.mxu1 %v7870_v1 }
  0xa4   :  { %6975 = vmatprep.subr.bf16.mxu1 %v7430_v36 }
  0xa5   :  { %6814 = vmatpush3.bf16.msra.mxu0 %v7635_v49  ;;  %v1123_v49 = vsub.f32 %v7824_v33, %v1122_v42  ;;  %v1144_v33 = vsub.f32 %v7846_v43, %v1143_v40  ;;  %v8513_v43 = vand.u32 4294901760, %v7718_v58  ;;  %v8522_v40 = vld [vmem:[#allocation6_spill] sm:$0xff] }
  0xa6   :  { %6816 = vmatprep.subr.bf16.mxu0 %v7653_v24  ;;  %6207 = vmatmul.mubr.f32.vlgmr.msra.gmra.mrb[0].mxu1 %v8504_v10 }
  0xa7   :  { %6977 = vmatpush3.bf16.msra.mxu1 %v7881_v15  ;;  %6217 = vmatprep.mubr.msk.f32.mxu1 %vm7431_vm8, %v8504_v10 }
  0xa8   :  { %6978 = vmatprep.subr.bf16.mxu1 %v7430_v36 }
  0xa9   :  { %6818 = vmatpush3.bf16.msra.mxu0 %v7653_v24  ;;  %v1130_v24 = vsub.f32 %v7831_v2, %v1129_v16  ;;  %v1145_v2 = vand.u32 4294901760, %v1144_v33  ;;  %v8518_v16 = vand.u32 4294901760, %v7740_v31 }
  0xaa   :  { %6820 = vmatprep.subr.bf16.mxu0 %v7663_v28 }
  0xab   :  { %6980 = vmatpush3.bf16.msra.mxu1 %v7890_v50 }
  0xac   :  { %6981 = vmatprep.subr.bf16.mxu1 %v7430_v36 }
  0xad   :  { %6822 = vmatpush3.bf16.msra.mxu0 %v7663_v28  ;;  %v1124_v28 = vand.u32 4294901760, %v1123_v49 }
  0xae   :  { %6824 = vmatprep.subr.bf16.mxu0 %v7667_v30  ;;  %6218 = vmatmul.mubr.f32.vlgmr.msra.gmra.mrb[0].mxu1 %v8504_v10 }
  0xaf   :  { %6983 = vmatpush3.bf16.msra.mxu1 %v7860_v53  ;;  %6228 = vmatprep.mubr.msk.f32.mxu1 %vm7431_vm8, %v8504_v10 }
  0xb0   :  { %5978 = vmatmul.mubr.msk.f32.vlgmr.msra.gmra.mrb[0].mxu0 %vm71_vm2, %v7432_v21  ;;  %6984 = vmatprep.subr.bf16.mxu1 %v7430_v36 }
  0xb1   :  { %5980 = vmatprep.mubr.msk.f32.mxu0 %vm72_vm1, %v7432_v21  ;;  %6826 = vmatpush3.bf16.msra.mxu0 %v7667_v30  ;;  %v1131_v30 = vand.u32 4294901760, %v1130_v24  ;;  %v8524_v24 = vand.u32 4294901760, %v7778_v7 }
  0xb2   :  { %6828 = vmatprep.subr.bf16.mxu0 %v7671_v37 }
  0xb3   :  { %6986 = vmatpush3.bf16.msra.mxu1 %v7870_v1 }
  0xb4   :  { %5981 = vmatmul.mubr.msk.f32.gmra.mrb[2].mxu0 %vm73_vm3, %v7432_v21  ;;  %6987 = vmatprep.subr.bf16.mxu1 %v7430_v36 }
  0xb5   :  { %5983 = vmatprep.mubr.msk.f32.mxu0 %vm74_vm4, %v7432_v21  ;;  %6830 = vmatpush3.bf16.msra.mxu0 %v7671_v37  ;;  %v7954_v37 = vpack.c.bf16 %v1131_v30, %v1124_v28  ;;  %v8527_v30 = vld [vmem:[#allocation8_spill] sm:$0xff] }
  0xb6   :  { %6832 = vmatprep.subr.bf16.mxu0 %v7675_v38  ;;  %6229 = vmatmul.mubr.f32.vlgmr.msra.gmra.mrb[0].mxu1 %v8504_v10 }
  0xb7   :  { %6989 = vmatpush3.bf16.msra.mxu1 %v7860_v53  ;;  %6239 = vmatprep.mubr.msk.f32.mxu1 %vm7431_vm8, %v8504_v10 }
  0xb8   :  { %5984 = vmatmul.mubr.msk.f32.gmra.mrb[4].mxu0 %vm75_vm5, %v7432_v21  ;;  %6990 = vmatprep.subr.bf16.mxu1 %v7430_v36 }
  0xb9   :  { %5986 = vmatprep.mubr.msk.f32.mxu0 %vm76_vm6, %v7432_v21  ;;  %6834 = vmatpush3.bf16.msra.mxu0 %v7675_v38  ;;  %v1137_v38 = vsub.f32 %v7833_v35, %v1136_v0  ;;  %v8506_v35 = vand.u32 4294901760, %v7716_v22 }
  0xba   :  { %6836 = vmatprep.subr.bf16.mxu0 %v7679_v39 }
  0xbb   :  { %6992 = vmatpush3.bf16.msra.mxu1 %v7870_v1  ;;  %v1138_v44 = vand.u32 4294901760, %v1137_v38 }
  0xbc   :  { %5987 = vmatmul.mubr.msk.f32.gmra.mrb[6].mxu0 %vm77_vm7, %v7432_v21  ;;  %6993 = vmatprep.subr.bf16.mxu1 %v7430_v36 }
  0xbd   :  { %6838 = vmatpush3.bf16.msra.mxu0 %v7679_v39  ;;  %6021 = vmatprep.mubr.f32.mxu0 %v7716_v22  ;;  %v7960_v5 = vpack.c.bf16 %v1145_v2, %v1138_v44  ;;  %v8507_v39 = vand.u32 4294901760, %v7539_v46  ;;  %v8514_v46 = vld [vmem:[#allocation3_spill] sm:$0xff] }
  0xbe   :  { %6840 = vmatprep.subr.bf16.mxu0 %v7683_v47  ;;  %v8515_v61 = vand.u32 4294901760, %v8514_v46  ;;  %v8533_v2 = vld [vmem:[#allocation11_spill] sm:$0xff] }
  0xc1   :  { %6842 = vmatpush3.bf16.msra.mxu0 %v7683_v47  ;;  %v8508_v47 = vand.u32 4294901760, %v7557_v56  ;;  %v8516_v56 = vld [vmem:[#allocation4_spill] sm:$0xff] }
  0xc2   :  { %6844 = vmatprep.subr.bf16.mxu0 %v7687_v48  ;;  %v8517_v57 = vand.u32 4294901760, %v8516_v56 }
  0xc4   :  { %v6895_v42 = vpack.c.bf16 %v8517_v57, %v8515_v61 }
  0xc5   :  { %6846 = vmatpush3.bf16.msra.mxu0 %v7687_v48  ;;  %v6887_v48 = vpack.c.bf16 %v8508_v47, %v8507_v39  ;;  %v8535_v39 = vld [vmem:[#allocation12_spill] sm:$0xff] }
  0xc6   :  { %6848 = vmatprep.subr.bf16.mxu0 %v7691_v51  ;;  %v8536_v47 = vand.u32 4294901760, %v8535_v39 }
  0xc9   :  { %6850 = vmatpush3.bf16.msra.mxu0 %v7691_v51  ;;  %v8509_v51 = vand.u32 4294901760, %v7502_v25  ;;  %v8519_v25 = vand.u32 4294901760, %v7776_v32 }
  0xca   :  { %6852 = vmatprep.subr.bf16.mxu0 %v7695_v55 }
  0xcd   :  { %6854 = vmatpush3.bf16.msra.mxu0 %v7695_v55  ;;  %v8510_v55 = vld [vmem:[#allocation2_spill] sm:$0xff] }
  0xce   :  { %6856 = vmatprep.subr.bf16.mxu0 %v7484_v17  ;;  %v8511_v22 = vand.u32 4294901760, %v8510_v55 }
  0xd0   :  { %6022 = vmatmul.mubr.f32.vlgmr.msra.gmra.mrb[0].mxu0 %v7738_v34  ;;  %v6891_v14 = vpack.c.bf16 %v8511_v22, %v8509_v51  ;;  %v8520_v34 = vld [vmem:[#allocation5_spill] sm:$0xff]  ;;  %v8539_v51 = vld [vmem:[#allocation14_spill] sm:$0xff] }
  0xd1   :  { %6024 = vmatprep.mubr.f32.mxu0 %v7718_v58  ;;  %6858 = vmatpush3.bf16.msra.mxu0 %v7484_v17  ;;  %v8521_v0 = vand.u32 4294901760, %v8520_v34  ;;  %v8523_v58 = vand.u32 4294901760, %v8522_v40  ;;  %v8540_v55 = vand.u32 4294901760, %v8539_v51 }
  0xd2   :  { %6860 = vmatprep.subr.bf16.mxu0 %v7486_v18 }
  0xd3   :  { %v6899_v49 = vpack.c.bf16 %v8523_v58, %v8521_v0 }
  0xd4   :  { %6025 = vmatmul.mubr.f32.gmra.mrb[2].mxu0 %v7740_v31  ;;  %v8525_v31 = vld [vmem:[#allocation7_spill] sm:$0xff] }
  0xd5   :  { %6027 = vmatprep.mubr.f32.mxu0 %v7776_v32  ;;  %6862 = vmatpush3.bf16.msra.mxu0 %v7486_v18  ;;  %v8526_v28 = vand.u32 4294901760, %v8525_v31  ;;  %v8528_v32 = vand.u32 4294901760, %v8527_v30 }
  0xd6   :  { %6864 = vmatprep.subr.bf16.mxu0 %v7507_v27 }
  0xd7   :  { %v6903_v38 = vpack.c.bf16 %v8528_v32, %v8526_v28 }
  0xd8   :  { %6028 = vmatmul.mubr.f32.gmra.mrb[4].mxu0 %v7778_v7  ;;  %v8529_v7 = vld [vmem:[#allocation9_spill] sm:$0xff] }
  0xd9   :  { %6030 = vmatprep.mubr.f32.mxu0 %v7809_v20  ;;  %6866 = vmatpush3.bf16.msra.mxu0 %v7507_v27  ;;  %v8530_v20 = vand.u32 4294901760, %v8529_v7 }
  0xda   :  { %6868 = vmatprep.subr.bf16.mxu0 %v7532_v41 }
  0xdc   :  { %6031 = vmatmul.mubr.f32.gmra.mrb[6].mxu0 %v7811_v59 }
  0xdd   :  { %6870 = vmatpush3.bf16.msra.mxu0 %v7532_v41  ;;  %6065 = vmatprep.mubr.f32.mxu0 %v8506_v35  ;;  %v8534_v35 = vand.u32 4294901760, %v8533_v2 }
  0xde   :  { %6872 = vmatprep.subr.bf16.mxu0 %v7555_v54 }
  0xdf   :  { %v6911_v59 = vpack.c.bf16 %v8536_v47, %v8534_v35 }
  0xe1   :  { %6874 = vmatpush3.bf16.msra.mxu0 %v7555_v54 }
  0xe2   :  { %6876 = vmatprep.subr.bf16.mxu0 %v7586_v9 }
  0xe5   :  { %6878 = vmatpush3.bf16.msra.mxu0 %v7586_v9 }
  0xe6   :  { %6880 = vmatprep.subr.bf16.mxu0 %v7613_v29 }
  0xe9   :  { %6882 = vmatpush3.bf16.msra.mxu0 %v7613_v29 }
  0xea   :  { %6884 = vmatprep.subr.bf16.mxu0 %v7628_v45 }
  0xed   :  { %6886 = vmatpush3.bf16.msra.mxu0 %v7628_v45 }
  0xee   :  { %6888 = vmatprep.subr.bf16.mxu0 %v6887_v48 }
  0xf0   :  { %6066 = vmatmul.mubr.f32.vlgmr.msra.gmra.mrb[0].mxu0 %v8512_v4 }
  0xf1   :  { %6068 = vmatprep.mubr.f32.mxu0 %v8513_v43  ;;  %6890 = vmatpush3.bf16.msra.mxu0 %v6887_v48 }
  0xf2   :  { %6892 = vmatprep.subr.bf16.mxu0 %v6891_v14 }
  0xf4   :  { %6069 = vmatmul.mubr.f32.gmra.mrb[2].mxu0 %v8518_v16 }
  0xf5   :  { %6071 = vmatprep.mubr.f32.mxu0 %v8519_v25  ;;  %6894 = vmatpush3.bf16.msra.mxu0 %v6891_v14 }
  0xf6   :  { %6896 = vmatprep.subr.bf16.mxu0 %v6895_v42 }
  0xf8   :  { %6072 = vmatmul.mubr.f32.gmra.mrb[4].mxu0 %v8524_v24 }
  0xf9   :  { %6074 = vmatprep.mubr.f32.mxu0 %v237_v8  ;;  %6898 = vmatpush3.bf16.msra.mxu0 %v6895_v42  ;;  %v8531_v8 = vld [vmem:[#allocation10_spill] sm:$0xff] }
  0xfa   :  { %6900 = vmatprep.subr.bf16.mxu0 %v6899_v49  ;;  %v8532_v33 = vand.u32 4294901760, %v8531_v8 }
  0xfc   :  { %6075 = vmatmul.mubr.f32.gmra.mrb[6].mxu0 %v247_v52  ;;  %v6907_v44 = vpack.c.bf16 %v8532_v33, %v8530_v20  ;;  %v8537_v52 = vld [vmem:[#allocation13_spill] sm:$0xff] }
  0xfd   :  { %6902 = vmatpush3.bf16.msra.mxu0 %v6899_v49  ;;  %6109 = vmatprep.mubr.msk.f32.mxu0 %vm70_vm0, %v7432_v21  ;;  %v8538_v48 = vand.u32 4294901760, %v8537_v52 }
  0xfe   :  { %6904 = vmatprep.subr.bf16.mxu0 %v6903_v38 }
  0xff   :  { %v6915_v22 = vpack.c.bf16 %v8540_v55, %v8538_v48 }
 0x101   :  { %6906 = vmatpush3.bf16.msra.mxu0 %v6903_v38 }
 0x102   :  { %6908 = vmatprep.subr.bf16.mxu0 %v6907_v44 }
 0x105   :  { %6910 = vmatpush3.bf16.msra.mxu0 %v6907_v44 }
 0x106   :  { %6912 = vmatprep.subr.bf16.mxu0 %v6911_v59 }
 0x109   :  { %6914 = vmatpush3.bf16.msra.mxu0 %v6911_v59 }
 0x10a   :  { %6916 = vmatprep.subr.bf16.mxu0 %v6915_v22 }
 0x10d   :  { %6918 = vmatpush3.bf16.msra.mxu0 %v6915_v22 }
 0x10e   :  { %6920 = vmatprep.subr.bf16.mxu0 %v7484_v17 }
 0x110   :  { %6110 = vmatmul.mubr.msk.f32.vlgmr.msra.gmra.mrb[0].mxu0 %vm71_vm2, %v7432_v21 }
 0x111   :  { %6112 = vmatprep.mubr.msk.f32.mxu0 %vm72_vm1, %v7432_v21  ;;  %6922 = vmatpush3.bf16.msra.mxu0 %v7484_v17 }
 0x112   :  { %6924 = vmatprep.subr.bf16.mxu0 %v7486_v18 }
 0x114   :  { %6113 = vmatmul.mubr.msk.f32.gmra.mrb[2].mxu0 %vm73_vm3, %v7432_v21 }
 0x115   :  { %6115 = vmatprep.mubr.msk.f32.mxu0 %vm74_vm4, %v7432_v21  ;;  %6926 = vmatpush3.bf16.msra.mxu0 %v7486_v18 }
 0x116   :  { %6928 = vmatprep.subr.bf16.mxu0 %v7507_v27 }
 0x118   :  { %6116 = vmatmul.mubr.msk.f32.gmra.mrb[4].mxu0 %vm75_vm5, %v7432_v21 }
 0x119   :  { %6118 = vmatprep.mubr.msk.f32.mxu0 %vm76_vm6, %v7432_v21  ;;  %6930 = vmatpush3.bf16.msra.mxu0 %v7507_v27 }
 0x11a   :  { %6932 = vmatprep.subr.bf16.mxu0 %v7532_v41 }
 0x11c   :  { %6119 = vmatmul.mubr.msk.f32.gmra.mrb[6].mxu0 %vm77_vm7, %v7432_v21 }
 0x11d   :  { %6934 = vmatpush3.bf16.msra.mxu0 %v7532_v41  ;;  %6153 = vmatprep.mubr.msk.f32.mxu0 %vm70_vm0, %v7432_v21 }
 0x11e   :  { %6936 = vmatprep.subr.bf16.mxu0 %v7555_v54 }
 0x121   :  { %6938 = vmatpush3.bf16.msra.mxu0 %v7555_v54 }
 0x122   :  { %6940 = vmatprep.subr.bf16.mxu0 %v7586_v9 }
 0x125   :  { %6942 = vmatpush3.bf16.msra.mxu0 %v7586_v9 }
 0x126   :  { %6944 = vmatprep.subr.bf16.mxu0 %v7613_v29 }
 0x129   :  { %6946 = vmatpush3.bf16.msra.mxu0 %v7613_v29 }
 0x12a   :  { %6948 = vmatprep.subr.bf16.mxu0 %v7628_v45 }
 0x12d   :  { %6950 = vmatpush3.bf16.msra.mxu0 %v7628_v45 }
 0x12e   :  { %6951 = vmatprep.subr.bf16.mxu0 %v7430_v36 }
 0x130   :  { %6154 = vmatmul.mubr.msk.f32.vlgmr.msra.gmra.mrb[0].mxu0 %vm71_vm2, %v7432_v21 }
 0x131   :  { %6156 = vmatprep.mubr.msk.f32.mxu0 %vm72_vm1, %v7432_v21  ;;  %6953 = vmatpush3.bf16.msra.mxu0 %v7860_v53 }
 0x132   :  { %6954 = vmatprep.subr.bf16.mxu0 %v7430_v36 }
 0x134   :  { %6157 = vmatmul.mubr.msk.f32.gmra.mrb[2].mxu0 %vm73_vm3, %v7432_v21 }
 0x135   :  { %6159 = vmatprep.mubr.msk.f32.mxu0 %vm74_vm4, %v7432_v21  ;;  %6956 = vmatpush3.bf16.msra.mxu0 %v7870_v1 }
 0x136   :  { %6957 = vmatprep.subr.bf16.mxu0 %v7430_v36 }
 0x138   :  { %6160 = vmatmul.mubr.msk.f32.gmra.mrb[4].mxu0 %vm75_vm5, %v7432_v21 }
 0x139   :  { %6162 = vmatprep.mubr.msk.f32.mxu0 %vm76_vm6, %v7432_v21 }
 0x13c   :  { %6163 = vmatmul.mubr.msk.f32.gmra.mrb[6].mxu0 %vm77_vm7, %v7432_v21 }
 0x13d   :  { %6173 = vmatprep.mubr.msk.f32.mxu0 %vm7431_vm8, %v8504_v10 }
 0x140   :  { %6174 = vmatmul.mubr.f32.vlgmr.msra.gmra.mrb[8].mxu0 %v8504_v10 }
 0x141   :  { %6959 = vmatpush3.bf16.msra.mxu0 %v7954_v37  ;;  %6184 = vmatprep.mubr.msk.f32.mxu0 %vm7431_vm8, %v8504_v10 }
 0x142   :  { %6960 = vmatprep.subr.bf16.mxu0 %v7430_v36 }
 0x145   :  { %6962 = vmatpush3.bf16.msra.mxu0 %v7960_v5 }
 0x146   :  { %7131 = vmatprep.subr.bf16.mxu0 %v7430_v36 }
 0x148   :  { %6185 = vmatmul.mubr.f32.vlgmr.msra.gmra.mrb[8].mxu0 %v8504_v10 }
 0x149   :  { %7133 = vmatpush3.bf16.msra.mxu0 %v7860_v53  ;;  %6503 = vmatprep.mubr.msk.f32.mxu0 %vm7431_vm8, %v8504_v10 }
 0x14a   :  { %7134 = vmatprep.subr.bf16.mxu0 %v7430_v36 }
 0x14d   :  { %7136 = vmatpush3.bf16.msra.mxu0 %v7870_v1 }
 0x14e   :  { %7137 = vmatprep.subr.bf16.mxu0 %v7430_v36 }
 0x189   :  { %v1521_v17 = vpop.f32.mrb[0].mxu1 }
 0x18a   :  { %v6230_v18 = vpop.f32.mrb[1].mxu1 }
 0x203   :  { %v6155_v27 = vpop.f32.mrb[0].mxu0 }
 0x204   :  { %v990_v41 = vpop.f32.mrb[1].mxu0 }
 0x207   :  { %v8139_v54 = vpop.f32.mrb[2].mxu0 }
 0x208   :  { %v8141_v62 = vpop.f32.mrb[3].mxu0 }
 0x20b   :  { %v8143_v9 = vpop.f32.mrb[4].mxu0 }
 0x20c   :  { %v8145_v13 = vpop.f32.mrb[5].mxu0 }
 0x20f   :  { %v8147_v29 = vpop.f32.mrb[6].mxu0 }
 0x210   :  { %v8149_v45 = vpop.f32.mrb[7].mxu0 }
 0x21b   :  { %v1206_v60 = vpop.f32.mrb[8].mxu0 }
 0x21c   :  { %v7275_v3 = vadd.f32 %v1521_v17, %v1206_v60  ;;  %v6186_v19 = vpop.f32.mrb[9].mxu0 }
 0x21e   :  { %v1525_v23 = vadd.f32 %v7275_v3, %v990_v41 }
 0x220   :  { %7412 = vtanh.f32 %v1525_v23 }
 0x22a   :  { %v7413_v63 = vpop.eup %7412 }
 0x22b   :  { %v1528_v11 = vsel %vm1036_vm9, %v7413_v63, 0 }
 0x22c   :  { %v1599_v12 = vand.u32 4294901760, %v1528_v11 }
 0x22e   :  { %v1600_v21 = vsub.f32 %v1528_v11, %v1599_v12 }
 0x230   :  { %v1601_v14 = vand.u32 4294901760, %v1600_v21 }
 0x232   :  { %v1602_v4 = vsub.f32 %v1600_v21, %v1601_v14 }
 0x234   :  { %v1603_v43 = vand.u32 4294901760, %v1602_v4 }
 0x236   :  { %6240 = vmatmul.mubr.f32.vlgmr.msra.gmra.mrb[2].mxu1 %v1603_v43 }
 0x237   :  { %6995 = vmatpush3.bf16.msra.mxu1 %v7954_v37  ;;  %6250 = vmatprep.mubr.msk.f32.mxu1 %vm7431_vm8, %v8504_v10 }
 0x238   :  { %6996 = vmatprep.subr.bf16.mxu1 %v7430_v36 }
 0x23b   :  { %6998 = vmatpush3.bf16.msra.mxu1 %v7960_v5 }
 0x23c   :  { %6999 = vmatprep.subr.bf16.mxu1 %v7430_v36 }
 0x23e   :  { %6251 = vmatmul.mubr.f32.vlgmr.msra.gmra.mrb[2].mxu1 %v1599_v12 }
 0x23f   :  { %7001 = vmatpush3.bf16.msra.mxu1 %v7843_v26  ;;  %6261 = vmatprep.mubr.msk.f32.mxu1 %vm7431_vm8, %v8504_v10 }
 0x240   :  { %7002 = vmatprep.subr.bf16.mxu1 %v7430_v36 }
 0x243   :  { %7004 = vmatpush3.bf16.msra.mxu1 %v7853_v6 }
 0x244   :  { %7005 = vmatprep.subr.bf16.mxu1 %v7430_v36 }
 0x246   :  { %6262 = vmatmul.mubr.f32.vlgmr.msra.gmra.mrb[2].mxu1 %v1600_v21 }
 0x247   :  { %7007 = vmatpush3.bf16.msra.mxu1 %v7860_v53  ;;  %6272 = vmatprep.mubr.msk.f32.mxu1 %vm7431_vm8, %v8504_v10 }
 0x248   :  { %7008 = vmatprep.subr.bf16.mxu1 %v7430_v36 }
 0x24b   :  { %7010 = vmatpush3.bf16.msra.mxu1 %v7870_v1 }
 0x24c   :  { %7011 = vmatprep.subr.bf16.mxu1 %v7430_v36 }
 0x24e   :  { %6273 = vmatmul.mubr.f32.vlgmr.msra.gmra.mrb[2].mxu1 %v1601_v14 }
 0x24f   :  { %7013 = vmatpush3.bf16.msra.mxu1 %v7881_v15  ;;  %6283 = vmatprep.mubr.msk.f32.mxu1 %vm7431_vm8, %v8504_v10 }
 0x250   :  { %7014 = vmatprep.subr.bf16.mxu1 %v7430_v36 }
 0x253   :  { %7016 = vmatpush3.bf16.msra.mxu1 %v7890_v50 }
 0x254   :  { %7017 = vmatprep.subr.bf16.mxu1 %v7430_v36 }
 0x256   :  { %6284 = vmatmul.mubr.f32.vlgmr.msra.gmra.mrb[2].mxu1 %v1599_v12 }
 0x257   :  { %7019 = vmatpush3.bf16.msra.mxu1 %v7860_v53  ;;  %6294 = vmatprep.mubr.msk.f32.mxu1 %vm7431_vm8, %v8504_v10 }
 0x258   :  { %7020 = vmatprep.subr.bf16.mxu1 %v7430_v36 }
 0x25b   :  { %7022 = vmatpush3.bf16.msra.mxu1 %v7870_v1 }
 0x25c   :  { %7023 = vmatprep.subr.bf16.mxu1 %v7430_v36 }
 0x25e   :  { %6295 = vmatmul.mubr.f32.vlgmr.msra.gmra.mrb[2].mxu1 %v1599_v12 }
 0x25f   :  { %7025 = vmatpush3.bf16.msra.mxu1 %v7860_v53  ;;  %6305 = vmatprep.mubr.msk.f32.mxu1 %vm7431_vm8, %v8504_v10 }
 0x260   :  { %7026 = vmatprep.subr.bf16.mxu1 %v7430_v36 }
 0x263   :  { %7028 = vmatpush3.bf16.msra.mxu1 %v7870_v1 }
 0x264   :  { %7029 = vmatprep.subr.bf16.mxu1 %v7430_v36 }
 0x331   :  { %v2011_v46 = vpop.f32.mrb[2].mxu1 }
 0x332   :  { %v2015_v61 = vadd.f32 %v6155_v27, %v2011_v46  ;;  %v6296_v56 = vpop.f32.mrb[3].mxu1 }
 0x334   :  { %7414 = vtanh.f32 %v2015_v61 }
 0x33e   :  { %v7415_v57 = vpop.eup %7414 }
 0x33f   :  { %v2018_v42 = vsel %vm1036_vm9, %v7415_v57, 0 }
 0x340   :  { %v2089_v16 = vand.u32 4294901760, %v2018_v42 }
 0x342   :  { %v2090_v25 = vsub.f32 %v2018_v42, %v2089_v16 }
 0x344   :  { %v2091_v34 = vand.u32 4294901760, %v2090_v25 }
 0x346   :  { %v2092_v0 = vsub.f32 %v2090_v25, %v2091_v34 }
 0x348   :  { %v2093_v40 = vand.u32 4294901760, %v2092_v0 }
 0x34a   :  { %6306 = vmatmul.mubr.f32.vlgmr.msra.gmra.mrb[4].mxu1 %v2093_v40 }
 0x34b   :  { %7031 = vmatpush3.bf16.msra.mxu1 %v7954_v37  ;;  %6316 = vmatprep.mubr.msk.f32.mxu1 %vm7431_vm8, %v8504_v10 }
 0x34c   :  { %7032 = vmatprep.subr.bf16.mxu1 %v7430_v36 }
 0x34f   :  { %7034 = vmatpush3.bf16.msra.mxu1 %v7960_v5 }
 0x350   :  { %7035 = vmatprep.subr.bf16.mxu1 %v7430_v36 }
 0x352   :  { %6317 = vmatmul.mubr.f32.vlgmr.msra.gmra.mrb[4].mxu1 %v2089_v16 }
 0x353   :  { %7037 = vmatpush3.bf16.msra.mxu1 %v7843_v26  ;;  %6327 = vmatprep.mubr.msk.f32.mxu1 %vm7431_vm8, %v8504_v10 }
 0x354   :  { %7038 = vmatprep.subr.bf16.mxu1 %v7430_v36 }
 0x357   :  { %7040 = vmatpush3.bf16.msra.mxu1 %v7853_v6 }
 0x358   :  { %7041 = vmatprep.subr.bf16.mxu1 %v7430_v36 }
 0x35a   :  { %6328 = vmatmul.mubr.f32.vlgmr.msra.gmra.mrb[4].mxu1 %v2090_v25 }
 0x35b   :  { %7043 = vmatpush3.bf16.msra.mxu1 %v7860_v53  ;;  %6338 = vmatprep.mubr.msk.f32.mxu1 %vm7431_vm8, %v8504_v10 }
 0x35c   :  { %7044 = vmatprep.subr.bf16.mxu1 %v7430_v36 }
 0x35f   :  { %7046 = vmatpush3.bf16.msra.mxu1 %v7870_v1 }
 0x360   :  { %7047 = vmatprep.subr.bf16.mxu1 %v7430_v36 }
 0x362   :  { %6339 = vmatmul.mubr.f32.vlgmr.msra.gmra.mrb[4].mxu1 %v2091_v34 }
 0x363   :  { %7049 = vmatpush3.bf16.msra.mxu1 %v7881_v15  ;;  %6349 = vmatprep.mubr.msk.f32.mxu1 %vm7431_vm8, %v8504_v10 }
 0x364   :  { %7050 = vmatprep.subr.bf16.mxu1 %v7430_v36 }
 0x367   :  { %7052 = vmatpush3.bf16.msra.mxu1 %v7890_v50 }
 0x368   :  { %7053 = vmatprep.subr.bf16.mxu1 %v7430_v36 }
 0x36a   :  { %6350 = vmatmul.mubr.f32.vlgmr.msra.gmra.mrb[4].mxu1 %v2089_v16 }
 0x36b   :  { %7055 = vmatpush3.bf16.msra.mxu1 %v7860_v53  ;;  %6360 = vmatprep.mubr.msk.f32.mxu1 %vm7431_vm8, %v8504_v10 }
 0x36c   :  { %7056 = vmatprep.subr.bf16.mxu1 %v7430_v36 }
 0x36f   :  { %7058 = vmatpush3.bf16.msra.mxu1 %v7870_v1 }
 0x370   :  { %7059 = vmatprep.subr.bf16.mxu1 %v7430_v36 }
 0x372   :  { %6361 = vmatmul.mubr.f32.vlgmr.msra.gmra.mrb[4].mxu1 %v2089_v16 }
 0x373   :  { %7061 = vmatpush3.bf16.msra.mxu1 %v7860_v53  ;;  %6371 = vmatprep.mubr.msk.f32.mxu1 %vm7431_vm8, %v8504_v10 }
 0x374   :  { %7062 = vmatprep.subr.bf16.mxu1 %v7430_v36 }
 0x377   :  { %7064 = vmatpush3.bf16.msra.mxu1 %v7870_v1 }
 0x378   :  { %7065 = vmatprep.subr.bf16.mxu1 %v7430_v36 }
 0x445   :  { %v2501_v58 = vpop.f32.mrb[4].mxu1 }
 0x446   :  { %v2505_v49 = vadd.f32 %v2501_v58, %v8141_v62  ;;  %v6362_v24 = vpop.f32.mrb[5].mxu1 }
 0x448   :  { %7416 = vtanh.f32 %v2505_v49 }
 0x452   :  { %v7417_v31 = vpop.eup %7416 }
 0x453   :  { %v2508_v28 = vsel %vm1036_vm9, %v7417_v31, 0 }
 0x454   :  { %v2579_v30 = vand.u32 4294901760, %v2508_v28 }
 0x456   :  { %v2580_v32 = vsub.f32 %v2508_v28, %v2579_v30 }
 0x458   :  { %v2581_v38 = vand.u32 4294901760, %v2580_v32 }
 0x45a   :  { %v2582_v7 = vsub.f32 %v2580_v32, %v2581_v38 }
 0x45c   :  { %v2583_v20 = vand.u32 4294901760, %v2582_v7 }
 0x45e   :  { %6372 = vmatmul.mubr.f32.vlgmr.msra.gmra.mrb[6].mxu1 %v2583_v20 }
 0x45f   :  { %7067 = vmatpush3.bf16.msra.mxu1 %v7954_v37  ;;  %6382 = vmatprep.mubr.msk.f32.mxu1 %vm7431_vm8, %v8504_v10 }
 0x460   :  { %7068 = vmatprep.subr.bf16.mxu1 %v7430_v36 }
 0x463   :  { %7070 = vmatpush3.bf16.msra.mxu1 %v7960_v5 }
 0x464   :  { %7071 = vmatprep.subr.bf16.mxu1 %v7430_v36 }
 0x466   :  { %6383 = vmatmul.mubr.f32.vlgmr.msra.gmra.mrb[6].mxu1 %v2579_v30 }
 0x467   :  { %7073 = vmatpush3.bf16.msra.mxu1 %v7843_v26  ;;  %6393 = vmatprep.mubr.msk.f32.mxu1 %vm7431_vm8, %v8504_v10 }
 0x468   :  { %7074 = vmatprep.subr.bf16.mxu1 %v7430_v36 }
 0x46b   :  { %7076 = vmatpush3.bf16.msra.mxu1 %v7853_v6 }
 0x46c   :  { %7077 = vmatprep.subr.bf16.mxu1 %v7430_v36 }
 0x46e   :  { %6394 = vmatmul.mubr.f32.vlgmr.msra.gmra.mrb[6].mxu1 %v2580_v32 }
 0x46f   :  { %7079 = vmatpush3.bf16.msra.mxu1 %v7860_v53  ;;  %6404 = vmatprep.mubr.msk.f32.mxu1 %vm7431_vm8, %v8504_v10 }
 0x470   :  { %7080 = vmatprep.subr.bf16.mxu1 %v7430_v36 }
 0x473   :  { %7082 = vmatpush3.bf16.msra.mxu1 %v7870_v1 }
 0x474   :  { %7083 = vmatprep.subr.bf16.mxu1 %v7430_v36 }
 0x476   :  { %6405 = vmatmul.mubr.f32.vlgmr.msra.gmra.mrb[6].mxu1 %v2581_v38 }
 0x477   :  { %7085 = vmatpush3.bf16.msra.mxu1 %v7881_v15  ;;  %6415 = vmatprep.mubr.msk.f32.mxu1 %vm7431_vm8, %v8504_v10 }
 0x478   :  { %7086 = vmatprep.subr.bf16.mxu1 %v7430_v36 }
 0x47b   :  { %7088 = vmatpush3.bf16.msra.mxu1 %v7890_v50 }
 0x47c   :  { %7089 = vmatprep.subr.bf16.mxu1 %v7430_v36 }
 0x47e   :  { %6416 = vmatmul.mubr.f32.vlgmr.msra.gmra.mrb[6].mxu1 %v2579_v30 }
 0x47f   :  { %7091 = vmatpush3.bf16.msra.mxu1 %v7860_v53  ;;  %6426 = vmatprep.mubr.msk.f32.mxu1 %vm7431_vm8, %v8504_v10 }
 0x480   :  { %7092 = vmatprep.subr.bf16.mxu1 %v7430_v36 }
 0x483   :  { %7094 = vmatpush3.bf16.msra.mxu1 %v7870_v1 }
 0x484   :  { %7095 = vmatprep.subr.bf16.mxu1 %v7430_v36 }
 0x486   :  { %6427 = vmatmul.mubr.f32.vlgmr.msra.gmra.mrb[6].mxu1 %v2579_v30 }
 0x487   :  { %7097 = vmatpush3.bf16.msra.mxu1 %v7860_v53  ;;  %6437 = vmatprep.mubr.msk.f32.mxu1 %vm7431_vm8, %v8504_v10 }
 0x488   :  { %7098 = vmatprep.subr.bf16.mxu1 %v7430_v36 }
 0x48b   :  { %7100 = vmatpush3.bf16.msra.mxu1 %v7870_v1 }
 0x48c   :  { %7101 = vmatprep.subr.bf16.mxu1 %v7430_v36 }
 0x559   :  { %v2991_v8 = vpop.f32.mrb[6].mxu1 }
 0x55a   :  { %v2995_v33 = vadd.f32 %v8139_v54, %v2991_v8  ;;  %v6428_v44 = vpop.f32.mrb[7].mxu1 }
 0x55c   :  { %7418 = vtanh.f32 %v2995_v33 }
 0x566   :  { %v7419_v2 = vpop.eup %7418 }
 0x567   :  { %v2998_v35 = vsel %vm1036_vm9, %v7419_v2, 0 }
 0x568   :  { %v3069_v39 = vand.u32 4294901760, %v2998_v35 }
 0x56a   :  { %v3070_v47 = vsub.f32 %v2998_v35, %v3069_v39 }
 0x56c   :  { %v3071_v59 = vand.u32 4294901760, %v3070_v47 }
 0x56e   :  { %v3072_v52 = vsub.f32 %v3070_v47, %v3071_v59 }
 0x570   :  { %v3073_v48 = vand.u32 4294901760, %v3072_v52 }
 0x572   :  { %6438 = vmatmul.mubr.f32.vlgmr.msra.gmra.mrb[8].mxu1 %v3073_v48 }
 0x573   :  { %7103 = vmatpush3.bf16.msra.mxu1 %v7954_v37  ;;  %6448 = vmatprep.mubr.msk.f32.mxu1 %vm7431_vm8, %v8504_v10 }
 0x574   :  { %7104 = vmatprep.subr.bf16.mxu1 %v7430_v36 }
 0x577   :  { %7106 = vmatpush3.bf16.msra.mxu1 %v7960_v5 }
 0x578   :  { %7107 = vmatprep.subr.bf16.mxu1 %v7430_v36 }
 0x57a   :  { %6449 = vmatmul.mubr.f32.vlgmr.msra.gmra.mrb[8].mxu1 %v3069_v39 }
 0x57b   :  { %7109 = vmatpush3.bf16.msra.mxu1 %v7843_v26  ;;  %6459 = vmatprep.mubr.msk.f32.mxu1 %vm7431_vm8, %v8504_v10 }
 0x57c   :  { %7110 = vmatprep.subr.bf16.mxu1 %v7430_v36 }
 0x57f   :  { %7112 = vmatpush3.bf16.msra.mxu1 %v7853_v6 }
 0x580   :  { %7113 = vmatprep.subr.bf16.mxu1 %v7430_v36 }
 0x582   :  { %6460 = vmatmul.mubr.f32.vlgmr.msra.gmra.mrb[8].mxu1 %v3070_v47 }
 0x583   :  { %7115 = vmatpush3.bf16.msra.mxu1 %v7860_v53  ;;  %6470 = vmatprep.mubr.msk.f32.mxu1 %vm7431_vm8, %v8504_v10 }
 0x584   :  { %7116 = vmatprep.subr.bf16.mxu1 %v7430_v36 }
 0x587   :  { %7118 = vmatpush3.bf16.msra.mxu1 %v7870_v1 }
 0x588   :  { %7119 = vmatprep.subr.bf16.mxu1 %v7430_v36 }
 0x58a   :  { %6471 = vmatmul.mubr.f32.vlgmr.msra.gmra.mrb[8].mxu1 %v3071_v59 }
 0x58b   :  { %7121 = vmatpush3.bf16.msra.mxu1 %v7881_v15  ;;  %6481 = vmatprep.mubr.msk.f32.mxu1 %vm7431_vm8, %v8504_v10 }
 0x58c   :  { %7122 = vmatprep.subr.bf16.mxu1 %v7430_v36 }
 0x58f   :  { %7124 = vmatpush3.bf16.msra.mxu1 %v7890_v50 }
 0x590   :  { %7125 = vmatprep.subr.bf16.mxu1 %v7430_v36 }
 0x592   :  { %6482 = vmatmul.mubr.f32.vlgmr.msra.gmra.mrb[8].mxu1 %v3069_v39 }
 0x593   :  { %7127 = vmatpush3.bf16.msra.mxu1 %v7860_v53  ;;  %6492 = vmatprep.mubr.msk.f32.mxu1 %vm7431_vm8, %v8504_v10 }
 0x594   :  { %7128 = vmatprep.subr.bf16.mxu1 %v7430_v36 }
 0x597   :  { %7130 = vmatpush3.bf16.msra.mxu1 %v7870_v1 }
 0x598   :  { %7167 = vmatprep.subr.bf16.mxu1 %v7430_v36 }
 0x59a   :  { %6493 = vmatmul.mubr.f32.vlgmr.msra.gmra.mrb[8].mxu1 %v3069_v39 }
 0x59b   :  { %7169 = vmatpush3.bf16.msra.mxu1 %v7860_v53  ;;  %6569 = vmatprep.mubr.msk.f32.mxu1 %vm7431_vm8, %v8504_v10 }
 0x59c   :  { %7170 = vmatprep.subr.bf16.mxu1 %v7430_v36 }
 0x59f   :  { %7172 = vmatpush3.bf16.msra.mxu1 %v7870_v1 }
 0x5a0   :  { %7173 = vmatprep.subr.bf16.mxu1 %v7430_v36 }
 0x66d   :  { %v3481_v51 = vpop.f32.mrb[8].mxu1 }
 0x66e   :  { %v3485_v55 = vadd.f32 %v3481_v51, %v8145_v13  ;;  %v6494_v22 = vpop.f32.mrb[9].mxu1 }
 0x670   :  { %7420 = vtanh.f32 %v3485_v55 }
 0x67a   :  { %v7421_v17 = vpop.eup %7420 }
 0x67b   :  { %v3488_v18 = vsel %vm1036_vm9, %v7421_v17, 0 }
 0x67c   :  { %v3559_v27 = vand.u32 4294901760, %v3488_v18 }
 0x67e   :  { %v3560_v41 = vsub.f32 %v3488_v18, %v3559_v27 }
 0x680   :  { %v3561_v54 = vand.u32 4294901760, %v3560_v41 }
 0x682   :  { %v3562_v62 = vsub.f32 %v3560_v41, %v3561_v54 }
 0x684   :  { %v3563_v60 = vand.u32 4294901760, %v3562_v62 }
 0x686   :  { %6504 = vmatmul.mubr.f32.vlgmr.msra.gmra.mrb[10].mxu0 %v3563_v60 }
 0x687   :  { %7139 = vmatpush3.bf16.msra.mxu0 %v7954_v37  ;;  %6514 = vmatprep.mubr.msk.f32.mxu0 %vm7431_vm8, %v8504_v10 }
 0x688   :  { %7140 = vmatprep.subr.bf16.mxu0 %v7430_v36 }
 0x68b   :  { %7142 = vmatpush3.bf16.msra.mxu0 %v7960_v5 }
 0x68c   :  { %7143 = vmatprep.subr.bf16.mxu0 %v7430_v36 }
 0x68e   :  { %6515 = vmatmul.mubr.f32.vlgmr.msra.gmra.mrb[10].mxu0 %v3559_v27 }
 0x68f   :  { %7145 = vmatpush3.bf16.msra.mxu0 %v7843_v26  ;;  %6525 = vmatprep.mubr.msk.f32.mxu0 %vm7431_vm8, %v8504_v10 }
 0x690   :  { %7146 = vmatprep.subr.bf16.mxu0 %v7430_v36 }
 0x693   :  { %7148 = vmatpush3.bf16.msra.mxu0 %v7853_v6 }
 0x694   :  { %7149 = vmatprep.subr.bf16.mxu0 %v7430_v36 }
 0x696   :  { %6526 = vmatmul.mubr.f32.vlgmr.msra.gmra.mrb[10].mxu0 %v3560_v41 }
 0x697   :  { %7151 = vmatpush3.bf16.msra.mxu0 %v7860_v53  ;;  %6536 = vmatprep.mubr.msk.f32.mxu0 %vm7431_vm8, %v8504_v10 }
 0x698   :  { %7152 = vmatprep.subr.bf16.mxu0 %v7430_v36 }
 0x69b   :  { %7154 = vmatpush3.bf16.msra.mxu0 %v7870_v1 }
 0x69c   :  { %7155 = vmatprep.subr.bf16.mxu0 %v7430_v36 }
 0x69e   :  { %6537 = vmatmul.mubr.f32.vlgmr.msra.gmra.mrb[10].mxu0 %v3561_v54 }
 0x69f   :  { %7157 = vmatpush3.bf16.msra.mxu0 %v7881_v15  ;;  %6547 = vmatprep.mubr.msk.f32.mxu0 %vm7431_vm8, %v8504_v10 }
 0x6a0   :  { %7158 = vmatprep.subr.bf16.mxu0 %v7430_v36 }
 0x6a3   :  { %7160 = vmatpush3.bf16.msra.mxu0 %v7890_v50 }
 0x6a4   :  { %7161 = vmatprep.subr.bf16.mxu0 %v7430_v36 }
 0x6a6   :  { %6548 = vmatmul.mubr.f32.vlgmr.msra.gmra.mrb[10].mxu0 %v3559_v27 }
 0x6a7   :  { %7163 = vmatpush3.bf16.msra.mxu0 %v7860_v53  ;;  %6558 = vmatprep.mubr.msk.f32.mxu0 %vm7431_vm8, %v8504_v10 }
 0x6a8   :  { %7164 = vmatprep.subr.bf16.mxu0 %v7430_v36 }
 0x6ab   :  { %7166 = vmatpush3.bf16.msra.mxu0 %v7870_v1 }
 0x6ac   :  { %7203 = vmatprep.subr.bf16.mxu0 %v7430_v36 }
 0x6ae   :  { %6559 = vmatmul.mubr.f32.vlgmr.msra.gmra.mrb[10].mxu0 %v3559_v27 }
 0x6af   :  { %7205 = vmatpush3.bf16.msra.mxu0 %v7860_v53  ;;  %6635 = vmatprep.mubr.msk.f32.mxu0 %vm7431_vm8, %v8504_v10 }
 0x6b0   :  { %7206 = vmatprep.subr.bf16.mxu0 %v7430_v36 }
 0x6b3   :  { %7208 = vmatpush3.bf16.msra.mxu0 %v7870_v1 }
 0x6b4   :  { %7209 = vmatprep.subr.bf16.mxu0 %v7430_v36 }
 0x781   :  { %v3971_v13 = vpop.f32.mrb[10].mxu0 }
 0x782   :  { %v3975_v3 = vadd.f32 %v8143_v9, %v3971_v13  ;;  %v6560_v19 = vpop.f32.mrb[11].mxu0 }
 0x784   :  { %7422 = vtanh.f32 %v3975_v3 }
 0x78e   :  { %v7423_v23 = vpop.eup %7422 }
 0x78f   :  { %v3978_v63 = vsel %vm1036_vm9, %v7423_v23, 0  ;;  %v35_v23 = vld [vmem:[%s8452_s1 + $0xc0] sm:$0xff] }
 0x790   :  { %v4049_v11 = vand.u32 4294901760, %v3978_v63 }
 0x792   :  { %v4050_v12 = vsub.f32 %v3978_v63, %v4049_v11 }
 0x794   :  { %v4051_v21 = vand.u32 4294901760, %v4050_v12 }
 0x796   :  { %v4052_v14 = vsub.f32 %v4050_v12, %v4051_v21 }
 0x798   :  { %v4053_v4 = vand.u32 4294901760, %v4052_v14 }
 0x79a   :  { %6570 = vmatmul.mubr.f32.vlgmr.msra.gmra.mrb[10].mxu1 %v4053_v4 }
 0x79b   :  { %7175 = vmatpush3.bf16.msra.mxu1 %v7954_v37  ;;  %6580 = vmatprep.mubr.msk.f32.mxu1 %vm7431_vm8, %v8504_v10 }
 0x79c   :  { %7176 = vmatprep.subr.bf16.mxu1 %v7430_v36 }
 0x79f   :  { %7178 = vmatpush3.bf16.msra.mxu1 %v7960_v5 }
 0x7a0   :  { %7179 = vmatprep.subr.bf16.mxu1 %v7430_v36 }
 0x7a2   :  { %6581 = vmatmul.mubr.f32.vlgmr.msra.gmra.mrb[10].mxu1 %v4049_v11 }
 0x7a3   :  { %7181 = vmatpush3.bf16.msra.mxu1 %v7843_v26  ;;  %6591 = vmatprep.mubr.msk.f32.mxu1 %vm7431_vm8, %v8504_v10 }
 0x7a4   :  { %7182 = vmatprep.subr.bf16.mxu1 %v7430_v36 }
 0x7a7   :  { %7184 = vmatpush3.bf16.msra.mxu1 %v7853_v6 }
 0x7a8   :  { %7185 = vmatprep.subr.bf16.mxu1 %v7430_v36 }
 0x7aa   :  { %6592 = vmatmul.mubr.f32.vlgmr.msra.gmra.mrb[10].mxu1 %v4050_v12 }
 0x7ab   :  { %7187 = vmatpush3.bf16.msra.mxu1 %v7860_v53  ;;  %6602 = vmatprep.mubr.msk.f32.mxu1 %vm7431_vm8, %v8504_v10 }
 0x7ac   :  { %7188 = vmatprep.subr.bf16.mxu1 %v7430_v36 }
 0x7af   :  { %7190 = vmatpush3.bf16.msra.mxu1 %v7870_v1 }
 0x7b0   :  { %7191 = vmatprep.subr.bf16.mxu1 %v7430_v36 }
 0x7b2   :  { %6603 = vmatmul.mubr.f32.vlgmr.msra.gmra.mrb[10].mxu1 %v4051_v21 }
 0x7b3   :  { %7193 = vmatpush3.bf16.msra.mxu1 %v7881_v15  ;;  %6613 = vmatprep.mubr.msk.f32.mxu1 %vm7431_vm8, %v8504_v10 }
 0x7b4   :  { %7194 = vmatprep.subr.bf16.mxu1 %v7430_v36 }
 0x7b7   :  { %7196 = vmatpush3.bf16.msra.mxu1 %v7890_v50 }
 0x7b8   :  { %7197 = vmatprep.subr.bf16.mxu1 %v7430_v36 }
 0x7ba   :  { %6614 = vmatmul.mubr.f32.vlgmr.msra.gmra.mrb[10].mxu1 %v4049_v11 }
 0x7bb   :  { %7199 = vmatpush3.bf16.msra.mxu1 %v7860_v53  ;;  %6624 = vmatprep.mubr.msk.f32.mxu1 %vm7431_vm8, %v8504_v10 }
 0x7bc   :  { %7200 = vmatprep.subr.bf16.mxu1 %v7430_v36 }
 0x7bf   :  { %7202 = vmatpush3.bf16.msra.mxu1 %v7870_v1 }
 0x7c0   :  { %7239 = vmatprep.subr.bf16.mxu1 %v7430_v36 }
 0x7c2   :  { %6625 = vmatmul.mubr.f32.vlgmr.msra.gmra.mrb[10].mxu1 %v4049_v11 }
 0x7c3   :  { %6701 = vmatprep.mubr.msk.f32.mxu1 %vm7431_vm8, %v8504_v10 }
 0x895   :  { %v4461_v9 = vpop.f32.mrb[10].mxu1 }
 0x896   :  { %v4465_v43 = vadd.f32 %v4461_v9, %v8149_v45  ;;  %v6626_v46 = vpop.f32.mrb[11].mxu1 }
 0x898   :  { %7424 = vtanh.f32 %v4465_v43 }
 0x8a2   :  { %v7425_v61 = vpop.eup %7424 }
 0x8a3   :  { %v4468_v56 = vsel %vm1036_vm9, %v7425_v61, 0 }
 0x8a4   :  { %v4539_v57 = vand.u32 4294901760, %v4468_v56 }
 0x8a6   :  { %v4540_v42 = vsub.f32 %v4468_v56, %v4539_v57 }
 0x8a8   :  { %v4541_v16 = vand.u32 4294901760, %v4540_v42 }
 0x8aa   :  { %v4542_v25 = vsub.f32 %v4540_v42, %v4541_v16 }
 0x8ac   :  { %v4543_v34 = vand.u32 4294901760, %v4542_v25 }
 0x8ae   :  { %6636 = vmatmul.mubr.f32.vlgmr.msra.gmra.mrb[12].mxu0 %v4543_v34 }
 0x8af   :  { %7211 = vmatpush3.bf16.msra.mxu0 %v7954_v37  ;;  %6646 = vmatprep.mubr.msk.f32.mxu0 %vm7431_vm8, %v8504_v10  ;;  %v34_v37 = vld [vmem:[%s8452_s1 + $0xb8] sm:$0xff] }
 0x8b0   :  { %7212 = vmatprep.subr.bf16.mxu0 %v7430_v36  ;;  %v4974_v40 = vand.u32 4294901760, %v34_v37 }
 0x8b2   :  { %v5066_v28 = vsub.f32 %v34_v37, %v4974_v40 }
 0x8b3   :  { %7214 = vmatpush3.bf16.msra.mxu0 %v7960_v5 }
 0x8b4   :  { %7215 = vmatprep.subr.bf16.mxu0 %v7430_v36  ;;  %v5067_v8 = vand.u32 4294901760, %v5066_v28 }
 0x8b6   :  { %6647 = vmatmul.mubr.f32.vlgmr.msra.gmra.mrb[12].mxu0 %v4539_v57  ;;  %v5068_v2 = vsub.f32 %v5066_v28, %v5067_v8 }
 0x8b7   :  { %7217 = vmatpush3.bf16.msra.mxu0 %v7843_v26  ;;  %6657 = vmatprep.mubr.msk.f32.mxu0 %vm7431_vm8, %v8504_v10  ;;  %v31_v26 = vld [vmem:[%s8452_s1 + $0xa0] sm:$0xff] }
 0x8b8   :  { %7218 = vmatprep.subr.bf16.mxu0 %v7430_v36  ;;  %v5069_v39 = vand.u32 4294901760, %v5068_v2 }
 0x8bb   :  { %7220 = vmatpush3.bf16.msra.mxu0 %v7853_v6  ;;  %v32_v6 = vld [vmem:[%s8452_s1 + $0xa8] sm:$0xff] }
 0x8bc   :  { %7221 = vmatprep.subr.bf16.mxu0 %v7430_v36 }
 0x8be   :  { %6658 = vmatmul.mubr.f32.vlgmr.msra.gmra.mrb[12].mxu0 %v4540_v42 }
 0x8bf   :  { %7223 = vmatpush3.bf16.msra.mxu0 %v7860_v53  ;;  %6668 = vmatprep.mubr.msk.f32.mxu0 %vm7431_vm8, %v8504_v10 }
 0x8c0   :  { %7224 = vmatprep.subr.bf16.mxu0 %v7430_v36 }
 0x8c3   :  { %7226 = vmatpush3.bf16.msra.mxu0 %v7870_v1 }
 0x8c4   :  { %7227 = vmatprep.subr.bf16.mxu0 %v7430_v36 }
 0x8c6   :  { %6669 = vmatmul.mubr.f32.vlgmr.msra.gmra.mrb[12].mxu0 %v4541_v16 }
 0x8c7   :  { %7229 = vmatpush3.bf16.msra.mxu0 %v7881_v15  ;;  %6679 = vmatprep.mubr.msk.f32.mxu0 %vm7431_vm8, %v8504_v10  ;;  %v4965_v15 = vand.u32 4294901760, %v31_v26 }
 0x8c8   :  { %7230 = vmatprep.subr.bf16.mxu0 %v7430_v36 }
 0x8c9   :  { %v5045_v5 = vsub.f32 %v31_v26, %v4965_v15 }
 0x8cb   :  { %7232 = vmatpush3.bf16.msra.mxu0 %v7890_v50  ;;  %v4968_v50 = vand.u32 4294901760, %v32_v6  ;;  %v5046_v49 = vand.u32 4294901760, %v5045_v5 }
 0x8cc   :  { %7233 = vmatprep.subr.bf16.mxu0 %v7430_v36 }
 0x8cd   :  { %v5052_v45 = vsub.f32 %v32_v6, %v4968_v50  ;;  %v5047_v30 = vsub.f32 %v5045_v5, %v5046_v49 }
 0x8ce   :  { %6680 = vmatmul.mubr.f32.vlgmr.msra.gmra.mrb[12].mxu0 %v4539_v57 }
 0x8cf   :  { %7235 = vmatpush3.bf16.msra.mxu0 %v7860_v53  ;;  %6690 = vmatprep.mubr.msk.f32.mxu0 %vm7431_vm8, %v8504_v10  ;;  %v33_v53 = vld [vmem:[%s8452_s1 + $0xb0] sm:$0xff]  ;;  %v5053_v24 = vand.u32 4294901760, %v5052_v45  ;;  %v5048_v38 = vand.u32 4294901760, %v5047_v30  ;;  %v7252_v59 = vpack.c.bf16 %v5052_v45, %v5045_v5 }
 0x8d0   :  { %7236 = vmatprep.subr.bf16.mxu0 %v7430_v36  ;;  %v4971_v0 = vand.u32 4294901760, %v33_v53 }
 0x8d1   :  { %v5054_v32 = vsub.f32 %v5052_v45, %v5053_v24  ;;  %v7264_v48 = vpack.c.bf16 %v5053_v24, %v5046_v49 }
 0x8d2   :  { %v5059_v58 = vsub.f32 %v33_v53, %v4971_v0  ;;  %v7243_v31 = vpack.c.bf16 %v4974_v40, %v4971_v0 }
 0x8d3   :  { %7238 = vmatpush3.bf16.msra.mxu0 %v7870_v1  ;;  %v8416_v1 = vpack.c.bf16 %v4968_v50, %v4965_v15  ;;  %v5055_v7 = vand.u32 4294901760, %v5054_v32 }
 0x8d4   :  { %v5060_v20 = vand.u32 4294901760, %v5059_v58  ;;  %v7255_v52 = vpack.c.bf16 %v5066_v28, %v5059_v58 }
 0x8d5   :  { %7241 = vmatpush3.bf16.msra.mxu1 %v8416_v1  ;;  %v7246_v33 = vpack.c.bf16 %v5055_v7, %v5048_v38 }
 0x8d6   :  { %6691 = vmatmul.mubr.f32.vlgmr.msra.gmra.mrb[12].mxu0 %v4539_v57  ;;  %7242 = vmatprep.subr.bf16.mxu1 %v7430_v36  ;;  %v5061_v44 = vsub.f32 %v5059_v58, %v5060_v20  ;;  %v7267_v51 = vpack.c.bf16 %v5067_v8, %v5060_v20 }
 0x8d8   :  { %v5062_v35 = vand.u32 4294901760, %v5061_v44 }
 0x8d9   :  { %7244 = vmatpush3.bf16.msra.mxu1 %v7243_v31 }
 0x8da   :  { %7245 = vmatprep.subr.bf16.mxu1 %v7430_v36  ;;  %v7249_v47 = vpack.c.bf16 %v5069_v39, %v5062_v35 }
 0x9a9   :  { %v4951_v55 = vpop.f32.mrb[12].mxu0 }
 0x9aa   :  { %v4955_v22 = vadd.f32 %v8147_v29, %v4951_v55  ;;  %v6692_v17 = vpop.f32.mrb[13].mxu0  ;;  %v8541_v29 = vlaneseq }
 0x9ac   :  { %7426 = vtanh.f32 %v4955_v22  ;;  %v4958_v3 = vshrl.u32 %v8541_v29, 7 }
 0x9ae   :  { %v4959_v19 = vsub.s32 0, %v4958_v3 }
 0x9b0   :  { %v4960_v63 = vrot.slane %v35_v23, %v4959_v19 }
 0x9b6   :  { %v7427_v18 = vpop.eup %7426 }
 0x9b7   :  { %v4962_v27 = vsel %vm1036_vm9, %v7427_v18, 0 }
 0x9b8   :  { %v5033_v41 = vand.u32 4294901760, %v4962_v27 }
 0x9ba   :  { %v5034_v54 = vsub.f32 %v4962_v27, %v5033_v41 }
 0x9bc   :  { %v5035_v62 = vand.u32 4294901760, %v5034_v54 }
 0x9be   :  { %v5036_v60 = vsub.f32 %v5034_v54, %v5035_v62 }
 0x9c0   :  { %v5037_v13 = vand.u32 4294901760, %v5036_v60 }
 0x9c2   :  { %6702 = vmatmul.mubr.f32.vlgmr.msra.gmra.mrb[12].mxu1 %v5037_v13 }
 0x9c3   :  { %7247 = vmatpush3.bf16.msra.mxu1 %v7246_v33  ;;  %6712 = vmatprep.mubr.msk.f32.mxu1 %vm7431_vm8, %v8504_v10 }
 0x9c4   :  { %7248 = vmatprep.subr.bf16.mxu1 %v7430_v36 }
 0x9c7   :  { %7250 = vmatpush3.bf16.msra.mxu1 %v7249_v47 }
 0x9c8   :  { %7251 = vmatprep.subr.bf16.mxu1 %v7430_v36 }
 0x9ca   :  { %6713 = vmatmul.mubr.f32.vlgmr.msra.gmra.mrb[12].mxu1 %v5033_v41 }
 0x9cb   :  { %7253 = vmatpush3.bf16.msra.mxu1 %v7252_v59  ;;  %6723 = vmatprep.mubr.msk.f32.mxu1 %vm7431_vm8, %v8504_v10 }
 0x9cc   :  { %7254 = vmatprep.subr.bf16.mxu1 %v7430_v36 }
 0x9cf   :  { %7256 = vmatpush3.bf16.msra.mxu1 %v7255_v52 }
 0x9d0   :  { %7257 = vmatprep.subr.bf16.mxu1 %v7430_v36 }
 0x9d2   :  { %6724 = vmatmul.mubr.f32.vlgmr.msra.gmra.mrb[12].mxu1 %v5034_v54 }
 0x9d3   :  { %7259 = vmatpush3.bf16.msra.mxu1 %v8416_v1  ;;  %6734 = vmatprep.mubr.msk.f32.mxu1 %vm7431_vm8, %v8504_v10 }
 0x9d4   :  { %7260 = vmatprep.subr.bf16.mxu1 %v7430_v36 }
 0x9d7   :  { %7262 = vmatpush3.bf16.msra.mxu1 %v7243_v31 }
 0x9d8   :  { %7263 = vmatprep.subr.bf16.mxu1 %v7430_v36 }
 0x9da   :  { %6735 = vmatmul.mubr.f32.vlgmr.msra.gmra.mrb[12].mxu1 %v5035_v62 }
 0x9db   :  { %7265 = vmatpush3.bf16.msra.mxu1 %v7264_v48  ;;  %6745 = vmatprep.mubr.msk.f32.mxu1 %vm7431_vm8, %v8504_v10 }
 0x9dc   :  { %7266 = vmatprep.subr.bf16.mxu1 %v7430_v36 }
 0x9df   :  { %7268 = vmatpush3.bf16.msra.mxu1 %v7267_v51 }
 0x9e0   :  { %7269 = vmatprep.subr.bf16.mxu1 %v7430_v36 }
 0x9e2   :  { %6746 = vmatmul.mubr.f32.vlgmr.msra.gmra.mrb[12].mxu1 %v5033_v41 }
 0x9e3   :  { %7271 = vmatpush3.bf16.msra.mxu1 %v8416_v1  ;;  %6756 = vmatprep.mubr.msk.f32.mxu1 %vm7431_vm8, %v8504_v10 }
 0x9e4   :  { %7272 = vmatprep.subr.bf16.mxu1 %v7430_v36 }
 0x9e7   :  { %7274 = vmatpush3.bf16.msra.mxu1 %v7243_v31 }
 0x9ea   :  { %6757 = vmatmul.mubr.f32.vlgmr.msra.gmra.mrb[12].mxu1 %v5033_v41 }
 0xabd   :  { %v5445_v11 = vpop.f32.mrb[12].mxu1 }
 0xabe   :  { %v7276_v12 = vadd.f32 %v5445_v11, %v4960_v63  ;;  %v6758_v21 = vpop.f32.mrb[13].mxu1 }
 0xac0   :  { %5450 = vst.msk [vmem:[%s8453_s2] sm:$0xff] %vm5449_vm10, %v7276_v12 }

</bundles_post_ra>
